<compile_context>
chip_gen: v7x
topology: tpu7x:2x2x1
jax: 0.10.0
libtpu: 0.0.40
codegen_flags: <defaults>
</compile_context>

<pallas_src>
import functools
import math

import jax
import jax.numpy as jnp
from jax import lax
from jax.experimental import pallas as pl
from jax.experimental.pallas import tpu as pltpu


def _mha_kernel(
    q1_ref, q2_ref, q3_ref, k_ref, v_ref,
    wq1_ref, wq2_ref, wq3_ref, wk_ref, wv_ref, wo_ref,
    bq1_ref, bq2_ref, bq3_ref, bk_ref, bv_ref, bo_ref,
    *rest, num_heads, head_dim, seq_t, has_mask,
):
    if has_mask:
        mask_ref, out_ref, attn1_ref = rest
    else:
        out_ref, attn1_ref = rest

    f32 = jnp.float32

    x1 = q1_ref[0]          # (T, E)
    x2 = q2_ref[0]
    x3 = q3_ref[0]
    xk = k_ref[0]           # (S, E)
    xv = v_ref[0]
    T = x1.shape[0]

    # Full-width (N = E) projections, f32 accumulation on the MXU.
    # Wq*/bq* already scaled by 1/(sqrt(hd)*temperature); Wv/bv already scaled by 1/3.
    q1f = jnp.dot(x1, wq1_ref[...], preferred_element_type=f32) + bq1_ref[...]
    q2f = jnp.dot(x2, wq2_ref[...], preferred_element_type=f32) + bq2_ref[...]
    q3f = jnp.dot(x3, wq3_ref[...], preferred_element_type=f32) + bq3_ref[...]
    kf = jnp.dot(xk, wk_ref[...], preferred_element_type=f32) + bk_ref[...]
    vf = jnp.dot(xv, wv_ref[...], preferred_element_type=f32) + bv_ref[...]

    if has_mask:
        mask = mask_ref[...]        # (T, S), already scaled by 1/temperature

    def flat_softmax_times_t(s):
        # softmax over the FLATTENED (T*S) scores == max/sum over both axes.
        m = jnp.max(jnp.max(s, axis=1, keepdims=True), axis=0, keepdims=True)
        e = jnp.exp(s - m)
        d = jnp.sum(jnp.sum(e, axis=1, keepdims=True), axis=0, keepdims=True)
        return e * (seq_t * pl.reciprocal(d, approx=True))

    o_cols = []
    w1_heads = []
    for h in range(num_heads):      # unrolled; static lane slices of the full-width projections
        lo = h * head_dim
        hi = lo + head_dim
        kh = kf[:, lo:hi]           # (S, hd)
        vh = vf[:, lo:hi]           # (S, hd), already carries the 1/3 factor

        # One score matmul for all three query streams: kh pushed once.
        qcat = jnp.concatenate(
            [q1f[:, lo:hi], q2f[:, lo:hi], q3f[:, lo:hi]], axis=0)       # (3T, hd)
        s_all = lax.dot_general(qcat, kh, (((1,), (1,)), ((), ())),
                                preferred_element_type=f32)              # (3T, S)

        s1 = s_all[0:T]
        s2 = s_all[T:2 * T]
        s3 = s_all[2 * T:3 * T]
        if has_mask:
            s1 = s1 + mask
            s2 = s2 + mask
            s3 = s3 + mask

        w1 = flat_softmax_times_t(s1)
        w1_heads.append(w1)
        wsum = w1 + flat_softmax_times_t(s2)       # don't keep w2/w3 live separately
        wsum = wsum + flat_softmax_times_t(s3)

        o_cols.append(jnp.dot(wsum, vh, preferred_element_type=f32))     # (T, hd)

    # Deferred out_proj: one lane-dense (T,E)@(E,E) matmul with un-split Wo.
    o_full = jnp.concatenate(o_cols, axis=-1)                            # (T, E)
    out = jnp.dot(o_full, wo_ref[...], preferred_element_type=f32) + bo_ref[...]
    out_ref[0] = out.astype(out_ref.dtype)

    # Returned attention map is w1 of every head for this batch (single store).
    attn1_ref[0] = jnp.stack(w1_heads, axis=0).astype(attn1_ref.dtype)   # (H, T, S)


def simple_multihead_attention(query1, query2, query3, key, value, params, *,
                               num_heads, temperature, attn_mask=None,
                               vmem_limit_bytes=None):
    """Fused Pallas forward. params use JAX convention: y = x @ W + b, W:(E_in,E_out)."""
    B, T, E = query1.shape
    _, S, _ = key.shape
    assert E % num_heads == 0
    hd = E // num_heads
    dtype = query1.dtype

    # Fold all scalar scales into the weights/biases (zero in-kernel cost).
    q_scale = 1.0 / (math.sqrt(hd) * float(temperature))
    wq1 = params["wq1"] * q_scale
    wq2 = params["wq2"] * q_scale
    wq3 = params["wq3"] * q_scale
    bq1 = (params["bq1"] * q_scale).reshape(1, E)
    bq2 = (params["bq2"] * q_scale).reshape(1, E)
    bq3 = (params["bq3"] * q_scale).reshape(1, E)
    wk = params["wk"]
    bk = params["bk"].reshape(1, E)
    wv = params["wv"] * (1.0 / 3.0)          # folds the (w1+w2+w3)/3 average
    bv = (params["bv"] * (1.0 / 3.0)).reshape(1, E)
    wo = params["wo"]
    bo = params["bo"].reshape(1, E)

    has_mask = attn_mask is not None

    kernel = functools.partial(
        _mha_kernel,
        num_heads=num_heads,
        head_dim=hd,
        seq_t=float(T),
        has_mask=has_mask,
    )

    batch3 = lambda b: (b, 0, 0)      # batch-resident activations
    const2 = lambda b: (0, 0)         # weights/biases resident across the whole grid

    in_specs = [
        pl.BlockSpec((1, T, E), batch3),   # query1
        pl.BlockSpec((1, T, E), batch3),   # query2
        pl.BlockSpec((1, T, E), batch3),   # query3
        pl.BlockSpec((1, S, E), batch3),   # key
        pl.BlockSpec((1, S, E), batch3),   # value
        pl.BlockSpec((E, E), const2),      # wq1
        pl.BlockSpec((E, E), const2),      # wq2
        pl.BlockSpec((E, E), const2),      # wq3
        pl.BlockSpec((E, E), const2),      # wk
        pl.BlockSpec((E, E), const2),      # wv
        pl.BlockSpec((E, E), const2),      # wo
        pl.BlockSpec((1, E), const2),      # bq1
        pl.BlockSpec((1, E), const2),      # bq2
        pl.BlockSpec((1, E), const2),      # bq3
        pl.BlockSpec((1, E), const2),      # bk
        pl.BlockSpec((1, E), const2),      # bv
        pl.BlockSpec((1, E), const2),      # bo
    ]
    operands = [query1, query2, query3, key, value,
                wq1, wq2, wq3, wk, wv, wo,
                bq1, bq2, bq3, bk, bv, bo]

    if has_mask:
        mask = (jnp.broadcast_to(attn_mask, (T, S)).astype(jnp.float32)
                / float(temperature))
        in_specs.append(pl.BlockSpec((T, S), const2))
        operands.append(mask)

    compiler_params = pltpu.CompilerParams(
        dimension_semantics=("parallel",),
        vmem_limit_bytes=vmem_limit_bytes,
    )

    out, attn1 = pl.pallas_call(
        kernel,
        out_shape=(
            jax.ShapeDtypeStruct((B, T, E), dtype),
            jax.ShapeDtypeStruct((B, num_heads, T, S), jnp.float32),
        ),
        grid_spec=pltpu.PrefetchScalarGridSpec(
            num_scalar_prefetch=0,
            grid=(B,),
            in_specs=in_specs,
            out_specs=(
                pl.BlockSpec((1, T, E), batch3),                          # output
                pl.BlockSpec((1, num_heads, T, S), lambda b: (b, 0, 0, 0)),  # attn_weights1
            ),
        ),
        compiler_params=compiler_params,
    )(*operands)
    return out, attn1


def reference_forward(query1, query2, query3, key, value, params, *,
                      num_heads, temperature, attn_mask=None):
    B, T, E = query1.shape
    _, S, _ = key.shape
    hd = E // num_heads
    prec = "highest"

    def lin(x, w, b):
        return jnp.matmul(x, w, precision=prec) + b

    q1 = lin(query1, params["wq1"], params["bq1"])
    q2 = lin(query2, params["wq2"], params["bq2"])
    q3 = lin(query3, params["wq3"], params["bq3"])
    k = lin(key, params["wk"], params["bk"])
    v = lin(value, params["wv"], params["bv"])

    def heads(x, L):
        return x.reshape(B, L, num_heads, hd).transpose(0, 2, 1, 3)

    q1, q2, q3 = heads(q1, T), heads(q2, T), heads(q3, T)
    k, v = heads(k, S), heads(v, S)

    def w_of(q):
        s = jnp.einsum("bhtd,bhsd->bhts", q, k, precision=prec) / math.sqrt(hd)
        if attn_mask is not None:
            s = s + attn_mask
        w = jax.nn.softmax((s / temperature).reshape(B, num_heads, -1), axis=-1)
        return w.reshape(B, num_heads, T, S) * T

    w1, w2, w3 = w_of(q1), w_of(q2), w_of(q3)
    o = jnp.einsum("bhts,bhsd->bhtd", (w1 + w2 + w3) / 3.0, v, precision=prec)
    o = o.transpose(0, 2, 1, 3).reshape(B, T, E)
    out = jnp.matmul(o, params["wo"], precision=prec) + params["bo"]
    return out, w1


if __name__ == "__main__":
    # Small shapes consistent with the module: B=2, T=S=8, E=128, H=4 heads.
    B, T, S = 2, 8, 8
    E, H = 128, 4
    temperature = 0.5
    dtype = jnp.float32
    hd = E // H

    keys = jax.random.split(jax.random.PRNGKey(0), 18)

    def rnd(k, shape, scale):
        return scale * jax.random.normal(k, shape, dtype=dtype)

    query1 = rnd(keys[0], (B, T, E), 1.0)
    query2 = rnd(keys[1], (B, T, E), 1.0)
    query3 = rnd(keys[2], (B, T, E), 1.0)
    key_in = rnd(keys[3], (B, S, E), 1.0)
    value = rnd(keys[4], (B, S, E), 1.0)
    attn_mask = rnd(keys[5], (T, S), 0.1)

    # NOTE: the PyTorch module zero-inits out_proj; random values are used here
    # so the out_proj matmul path is actually exercised by the numerical check.
    params = {
        "wq1": rnd(keys[6], (E, E), 0.05), "bq1": rnd(keys[7], (E,), 0.05),
        "wq2": rnd(keys[8], (E, E), 0.05), "bq2": rnd(keys[9], (E,), 0.05),
        "wq3": rnd(keys[10], (E, E), 0.05), "bq3": rnd(keys[11], (E,), 0.05),
        "wk": rnd(keys[12], (E, E), 0.05), "bk": rnd(keys[13], (E,), 0.05),
        "wv": rnd(keys[14], (E, E), 0.05), "bv": rnd(keys[15], (E,), 0.05),
        "wo": rnd(keys[16], (E, E), 0.05), "bo": rnd(keys[17], (E,), 0.05),
    }

    out, attn1 = simple_multihead_attention(
        query1, query2, query3, key_in, value, params,
        num_heads=H, temperature=temperature, attn_mask=attn_mask)
    out = jax.block_until_ready(out)
    attn1 = jax.block_until_ready(attn1)

    ref_out, ref_attn1 = reference_forward(
        query1, query2, query3, key_in, value, params,
        num_heads=H, temperature=temperature, attn_mask=attn_mask)

    assert out.shape == (B, T, E) and out.dtype == dtype
    assert attn1.shape == (B, H, T, S)
    assert jnp.allclose(out, ref_out, atol=5e-3, rtol=5e-3), "output mismatch vs reference"
    assert jnp.allclose(attn1, ref_attn1, atol=5e-3, rtol=5e-3), "attn_weights1 mismatch vs reference"
    print("KERNEL_OK")
</pallas_src>

<mosaic_0001>
module attributes {stable_mosaic.version = 11 : i64} {
  func.func @_mha_kernel(%arg0: i32, %arg1: memref<1x8x128xf32, #tpu.memory_space<vmem>>, %arg2: memref<1x8x128xf32, #tpu.memory_space<vmem>>, %arg3: memref<1x8x128xf32, #tpu.memory_space<vmem>>, %arg4: memref<1x8x128xf32, #tpu.memory_space<vmem>>, %arg5: memref<1x8x128xf32, #tpu.memory_space<vmem>>, %arg6: memref<128x128xf32, #tpu.memory_space<vmem>>, %arg7: memref<128x128xf32, #tpu.memory_space<vmem>>, %arg8: memref<128x128xf32, #tpu.memory_space<vmem>>, %arg9: memref<128x128xf32, #tpu.memory_space<vmem>>, %arg10: memref<128x128xf32, #tpu.memory_space<vmem>>, %arg11: memref<128x128xf32, #tpu.memory_space<vmem>>, %arg12: memref<1x128xf32, #tpu.memory_space<vmem>>, %arg13: memref<1x128xf32, #tpu.memory_space<vmem>>, %arg14: memref<1x128xf32, #tpu.memory_space<vmem>>, %arg15: memref<1x128xf32, #tpu.memory_space<vmem>>, %arg16: memref<1x128xf32, #tpu.memory_space<vmem>>, %arg17: memref<1x128xf32, #tpu.memory_space<vmem>>, %arg18: memref<8x8xf32, #tpu.memory_space<vmem>>, %arg19: memref<1x8x128xf32, #tpu.memory_space<vmem>>, %arg20: memref<1x4x8x8xf32, #tpu.memory_space<vmem>>) attributes {dimension_semantics = [#tpu.dimension_semantics<parallel>], iteration_bounds = array<i64: 2>, scalar_prefetch = 0 : i64, scratch_operands = 0 : i64, tpu.core_type = #tpu.core_type<tc>, window_params = [{transform_indices = @transform_0, window_bounds = array<i64: 1, 8, 128>}, {transform_indices = @transform_1, window_bounds = array<i64: 1, 8, 128>}, {transform_indices = @transform_2, window_bounds = array<i64: 1, 8, 128>}, {transform_indices = @transform_3, window_bounds = array<i64: 1, 8, 128>}, {transform_indices = @transform_4, window_bounds = array<i64: 1, 8, 128>}, {pipeline_mode = #tpu.pipeline_mode<synchronous>, transform_indices = @transform_5, window_bounds = array<i64: 128, 128>}, {pipeline_mode = #tpu.pipeline_mode<synchronous>, transform_indices = @transform_6, window_bounds = array<i64: 128, 128>}, {pipeline_mode = #tpu.pipeline_mode<synchronous>, transform_indices = @transform_7, window_bounds = array<i64: 128, 128>}, {pipeline_mode = #tpu.pipeline_mode<synchronous>, transform_indices = @transform_8, window_bounds = array<i64: 128, 128>}, {pipeline_mode = #tpu.pipeline_mode<synchronous>, transform_indices = @transform_9, window_bounds = array<i64: 128, 128>}, {pipeline_mode = #tpu.pipeline_mode<synchronous>, transform_indices = @transform_10, window_bounds = array<i64: 128, 128>}, {pipeline_mode = #tpu.pipeline_mode<synchronous>, transform_indices = @transform_11, window_bounds = array<i64: 1, 128>}, {pipeline_mode = #tpu.pipeline_mode<synchronous>, transform_indices = @transform_12, window_bounds = array<i64: 1, 128>}, {pipeline_mode = #tpu.pipeline_mode<synchronous>, transform_indices = @transform_13, window_bounds = array<i64: 1, 128>}, {pipeline_mode = #tpu.pipeline_mode<synchronous>, transform_indices = @transform_14, window_bounds = array<i64: 1, 128>}, {pipeline_mode = #tpu.pipeline_mode<synchronous>, transform_indices = @transform_15, window_bounds = array<i64: 1, 128>}, {pipeline_mode = #tpu.pipeline_mode<synchronous>, transform_indices = @transform_16, window_bounds = array<i64: 1, 128>}, {pipeline_mode = #tpu.pipeline_mode<synchronous>, transform_indices = @transform_17, window_bounds = array<i64: 8, 8>}, {transform_indices = @transform_18, window_bounds = array<i64: 1, 8, 128>}, {transform_indices = @transform_19, window_bounds = array<i64: 1, 4, 8, 8>}]} {
    %c0 = arith.constant 0 : index
    %c0_0 = arith.constant 0 : index
    %c0_1 = arith.constant 0 : index
    %0 = vector.load %arg1[%c0, %c0_0, %c0_1] : memref<1x8x128xf32, #tpu.memory_space<vmem>>, vector<1x8x128xf32>
    %1 = vector.shape_cast %0 : vector<1x8x128xf32> to vector<8x128xf32>
    %c0_2 = arith.constant 0 : index
    %c0_3 = arith.constant 0 : index
    %c0_4 = arith.constant 0 : index
    %2 = vector.load %arg2[%c0_2, %c0_3, %c0_4] : memref<1x8x128xf32, #tpu.memory_space<vmem>>, vector<1x8x128xf32>
    %3 = vector.shape_cast %2 : vector<1x8x128xf32> to vector<8x128xf32>
    %c0_5 = arith.constant 0 : index
    %c0_6 = arith.constant 0 : index
    %c0_7 = arith.constant 0 : index
    %4 = vector.load %arg3[%c0_5, %c0_6, %c0_7] : memref<1x8x128xf32, #tpu.memory_space<vmem>>, vector<1x8x128xf32>
    %5 = vector.shape_cast %4 : vector<1x8x128xf32> to vector<8x128xf32>
    %c0_8 = arith.constant 0 : index
    %c0_9 = arith.constant 0 : index
    %c0_10 = arith.constant 0 : index
    %6 = vector.load %arg4[%c0_8, %c0_9, %c0_10] : memref<1x8x128xf32, #tpu.memory_space<vmem>>, vector<1x8x128xf32>
    %7 = vector.shape_cast %6 : vector<1x8x128xf32> to vector<8x128xf32>
    %c0_11 = arith.constant 0 : index
    %c0_12 = arith.constant 0 : index
    %c0_13 = arith.constant 0 : index
    %8 = vector.load %arg5[%c0_11, %c0_12, %c0_13] : memref<1x8x128xf32, #tpu.memory_space<vmem>>, vector<1x8x128xf32>
    %9 = vector.shape_cast %8 : vector<1x8x128xf32> to vector<8x128xf32>
    %c0_14 = arith.constant 0 : index
    %c0_15 = arith.constant 0 : index
    %10 = vector.load %arg6[%c0_14, %c0_15] : memref<128x128xf32, #tpu.memory_space<vmem>>, vector<128x128xf32>
    %cst = arith.constant dense<0.000000e+00> : vector<8x128xf32>
    %11 = tpu.matmul %1, %10, %cst {dimension_numbers = #tpu.dot_dimension_numbers<[1], [0], [0], [1], [0, 0, 1, 1], [], []>} : vector<8x128xf32>, vector<128x128xf32>, vector<8x128xf32> -> vector<8x128xf32>
    %c0_16 = arith.constant 0 : index
    %c0_17 = arith.constant 0 : index
    %12 = vector.load %arg12[%c0_16, %c0_17] : memref<1x128xf32, #tpu.memory_space<vmem>>, vector<1x128xf32>
    %13 = vector.broadcast %12 : vector<1x128xf32> to vector<8x128xf32>
    %14 = arith.addf %11, %13 : vector<8x128xf32>
    %c0_18 = arith.constant 0 : index
    %c0_19 = arith.constant 0 : index
    %15 = vector.load %arg7[%c0_18, %c0_19] : memref<128x128xf32, #tpu.memory_space<vmem>>, vector<128x128xf32>
    %cst_20 = arith.constant dense<0.000000e+00> : vector<8x128xf32>
    %16 = tpu.matmul %3, %15, %cst_20 {dimension_numbers = #tpu.dot_dimension_numbers<[1], [0], [0], [1], [0, 0, 1, 1], [], []>} : vector<8x128xf32>, vector<128x128xf32>, vector<8x128xf32> -> vector<8x128xf32>
    %c0_21 = arith.constant 0 : index
    %c0_22 = arith.constant 0 : index
    %17 = vector.load %arg13[%c0_21, %c0_22] : memref<1x128xf32, #tpu.memory_space<vmem>>, vector<1x128xf32>
    %18 = vector.broadcast %17 : vector<1x128xf32> to vector<8x128xf32>
    %19 = arith.addf %16, %18 : vector<8x128xf32>
    %c0_23 = arith.constant 0 : index
    %c0_24 = arith.constant 0 : index
    %20 = vector.load %arg8[%c0_23, %c0_24] : memref<128x128xf32, #tpu.memory_space<vmem>>, vector<128x128xf32>
    %cst_25 = arith.constant dense<0.000000e+00> : vector<8x128xf32>
    %21 = tpu.matmul %5, %20, %cst_25 {dimension_numbers = #tpu.dot_dimension_numbers<[1], [0], [0], [1], [0, 0, 1, 1], [], []>} : vector<8x128xf32>, vector<128x128xf32>, vector<8x128xf32> -> vector<8x128xf32>
    %c0_26 = arith.constant 0 : index
    %c0_27 = arith.constant 0 : index
    %22 = vector.load %arg14[%c0_26, %c0_27] : memref<1x128xf32, #tpu.memory_space<vmem>>, vector<1x128xf32>
    %23 = vector.broadcast %22 : vector<1x128xf32> to vector<8x128xf32>
    %24 = arith.addf %21, %23 : vector<8x128xf32>
    %c0_28 = arith.constant 0 : index
    %c0_29 = arith.constant 0 : index
    %25 = vector.load %arg9[%c0_28, %c0_29] : memref<128x128xf32, #tpu.memory_space<vmem>>, vector<128x128xf32>
    %cst_30 = arith.constant dense<0.000000e+00> : vector<8x128xf32>
    %26 = tpu.matmul %7, %25, %cst_30 {dimension_numbers = #tpu.dot_dimension_numbers<[1], [0], [0], [1], [0, 0, 1, 1], [], []>} : vector<8x128xf32>, vector<128x128xf32>, vector<8x128xf32> -> vector<8x128xf32>
    %c0_31 = arith.constant 0 : index
    %c0_32 = arith.constant 0 : index
    %27 = vector.load %arg15[%c0_31, %c0_32] : memref<1x128xf32, #tpu.memory_space<vmem>>, vector<1x128xf32>
    %28 = vector.broadcast %27 : vector<1x128xf32> to vector<8x128xf32>
    %29 = arith.addf %26, %28 : vector<8x128xf32>
    %c0_33 = arith.constant 0 : index
    %c0_34 = arith.constant 0 : index
    %30 = vector.load %arg10[%c0_33, %c0_34] : memref<128x128xf32, #tpu.memory_space<vmem>>, vector<128x128xf32>
    %cst_35 = arith.constant dense<0.000000e+00> : vector<8x128xf32>
    %31 = tpu.matmul %9, %30, %cst_35 {dimension_numbers = #tpu.dot_dimension_numbers<[1], [0], [0], [1], [0, 0, 1, 1], [], []>} : vector<8x128xf32>, vector<128x128xf32>, vector<8x128xf32> -> vector<8x128xf32>
    %c0_36 = arith.constant 0 : index
    %c0_37 = arith.constant 0 : index
    %32 = vector.load %arg16[%c0_36, %c0_37] : memref<1x128xf32, #tpu.memory_space<vmem>>, vector<1x128xf32>
    %33 = vector.broadcast %32 : vector<1x128xf32> to vector<8x128xf32>
    %34 = arith.addf %31, %33 : vector<8x128xf32>
    %c0_38 = arith.constant 0 : index
    %c0_39 = arith.constant 0 : index
    %35 = vector.load %arg18[%c0_38, %c0_39] : memref<8x8xf32, #tpu.memory_space<vmem>>, vector<8x8xf32>
    %36 = vector.extract_strided_slice %29 {offsets = [0, 0], sizes = [8, 32], strides = [1, 1]} : vector<8x128xf32> to vector<8x32xf32>
    %37 = vector.extract_strided_slice %34 {offsets = [0, 0], sizes = [8, 32], strides = [1, 1]} : vector<8x128xf32> to vector<8x32xf32>
    %38 = vector.extract_strided_slice %14 {offsets = [0, 0], sizes = [8, 32], strides = [1, 1]} : vector<8x128xf32> to vector<8x32xf32>
    %39 = vector.extract_strided_slice %19 {offsets = [0, 0], sizes = [8, 32], strides = [1, 1]} : vector<8x128xf32> to vector<8x32xf32>
    %40 = vector.extract_strided_slice %24 {offsets = [0, 0], sizes = [8, 32], strides = [1, 1]} : vector<8x128xf32> to vector<8x32xf32>
    %41 = tpu.concatenate %38, %39, %40 in 0 : vector<8x32xf32>, vector<8x32xf32>, vector<8x32xf32> -> vector<24x32xf32>
    %cst_40 = arith.constant dense<0.000000e+00> : vector<24x8xf32>
    %42 = tpu.matmul %41, %36, %cst_40 {dimension_numbers = #tpu.dot_dimension_numbers<[1], [1], [0], [0], [0, 0, 1, 0], [], []>} : vector<24x32xf32>, vector<8x32xf32>, vector<24x8xf32> -> vector<24x8xf32>
    %43 = vector.extract_strided_slice %42 {offsets = [0, 0], sizes = [8, 8], strides = [1, 1]} : vector<24x8xf32> to vector<8x8xf32>
    %44 = vector.extract_strided_slice %42 {offsets = [8, 0], sizes = [8, 8], strides = [1, 1]} : vector<24x8xf32> to vector<8x8xf32>
    %45 = vector.extract_strided_slice %42 {offsets = [16, 0], sizes = [8, 8], strides = [1, 1]} : vector<24x8xf32> to vector<8x8xf32>
    %46 = arith.addf %43, %35 : vector<8x8xf32>
    %47 = arith.addf %44, %35 : vector<8x8xf32>
    %48 = arith.addf %45, %35 : vector<8x8xf32>
    %cst_41 = arith.constant dense<0xFF800000> : vector<8xf32>
    %49 = vector.multi_reduction <maximumf>, %46, %cst_41 [1] : vector<8x8xf32> to vector<8xf32>
    %50 = vector.shape_cast %49 : vector<8xf32> to vector<8x1xf32>
    %cst_42 = arith.constant dense<0xFF800000> : vector<1xf32>
    %51 = vector.multi_reduction <maximumf>, %50, %cst_42 [0] : vector<8x1xf32> to vector<1xf32>
    %52 = vector.shape_cast %51 : vector<1xf32> to vector<1x1xf32>
    %53 = vector.broadcast %52 : vector<1x1xf32> to vector<8x8xf32>
    %54 = arith.subf %46, %53 : vector<8x8xf32>
    %55 = math.exp %54 : vector<8x8xf32>
    %cst_43 = arith.constant dense<0.000000e+00> : vector<8xf32>
    %56 = vector.multi_reduction <add>, %55, %cst_43 [1] : vector<8x8xf32> to vector<8xf32>
    %57 = vector.shape_cast %56 : vector<8xf32> to vector<8x1xf32>
    %cst_44 = arith.constant dense<0.000000e+00> : vector<1xf32>
    %58 = vector.multi_reduction <add>, %57, %cst_44 [0] : vector<8x1xf32> to vector<1xf32>
    %59 = vector.shape_cast %58 : vector<1xf32> to vector<1x1xf32>
    %60 = tpu.reciprocal %59 {approx = true} : vector<1x1xf32> -> vector<1x1xf32>
    %cst_45 = arith.constant 8.000000e+00 : f32
    %61 = vector.broadcast %cst_45 : f32 to vector<1x1xf32>
    %62 = arith.mulf %61, %60 : vector<1x1xf32>
    %63 = vector.broadcast %62 : vector<1x1xf32> to vector<8x8xf32>
    %64 = arith.mulf %55, %63 : vector<8x8xf32>
    %cst_46 = arith.constant dense<0xFF800000> : vector<8xf32>
    %65 = vector.multi_reduction <maximumf>, %47, %cst_46 [1] : vector<8x8xf32> to vector<8xf32>
    %66 = vector.shape_cast %65 : vector<8xf32> to vector<8x1xf32>
    %cst_47 = arith.constant dense<0xFF800000> : vector<1xf32>
    %67 = vector.multi_reduction <maximumf>, %66, %cst_47 [0] : vector<8x1xf32> to vector<1xf32>
    %68 = vector.shape_cast %67 : vector<1xf32> to vector<1x1xf32>
    %69 = vector.broadcast %68 : vector<1x1xf32> to vector<8x8xf32>
    %70 = arith.subf %47, %69 : vector<8x8xf32>
    %71 = math.exp %70 : vector<8x8xf32>
    %cst_48 = arith.constant dense<0.000000e+00> : vector<8xf32>
    %72 = vector.multi_reduction <add>, %71, %cst_48 [1] : vector<8x8xf32> to vector<8xf32>
    %73 = vector.shape_cast %72 : vector<8xf32> to vector<8x1xf32>
    %cst_49 = arith.constant dense<0.000000e+00> : vector<1xf32>
    %74 = vector.multi_reduction <add>, %73, %cst_49 [0] : vector<8x1xf32> to vector<1xf32>
    %75 = vector.shape_cast %74 : vector<1xf32> to vector<1x1xf32>
    %76 = tpu.reciprocal %75 {approx = true} : vector<1x1xf32> -> vector<1x1xf32>
    %cst_50 = arith.constant 8.000000e+00 : f32
    %77 = vector.broadcast %cst_50 : f32 to vector<1x1xf32>
    %78 = arith.mulf %77, %76 : vector<1x1xf32>
    %79 = vector.broadcast %78 : vector<1x1xf32> to vector<8x8xf32>
    %80 = arith.mulf %71, %79 : vector<8x8xf32>
    %81 = arith.addf %64, %80 : vector<8x8xf32>
    %cst_51 = arith.constant dense<0xFF800000> : vector<8xf32>
    %82 = vector.multi_reduction <maximumf>, %48, %cst_51 [1] : vector<8x8xf32> to vector<8xf32>
    %83 = vector.shape_cast %82 : vector<8xf32> to vector<8x1xf32>
    %cst_52 = arith.constant dense<0xFF800000> : vector<1xf32>
    %84 = vector.multi_reduction <maximumf>, %83, %cst_52 [0] : vector<8x1xf32> to vector<1xf32>
    %85 = vector.shape_cast %84 : vector<1xf32> to vector<1x1xf32>
    %86 = vector.broadcast %85 : vector<1x1xf32> to vector<8x8xf32>
    %87 = arith.subf %48, %86 : vector<8x8xf32>
    %88 = math.exp %87 : vector<8x8xf32>
    %cst_53 = arith.constant dense<0.000000e+00> : vector<8xf32>
    %89 = vector.multi_reduction <add>, %88, %cst_53 [1] : vector<8x8xf32> to vector<8xf32>
    %90 = vector.shape_cast %89 : vector<8xf32> to vector<8x1xf32>
    %cst_54 = arith.constant dense<0.000000e+00> : vector<1xf32>
    %91 = vector.multi_reduction <add>, %90, %cst_54 [0] : vector<8x1xf32> to vector<1xf32>
    %92 = vector.shape_cast %91 : vector<1xf32> to vector<1x1xf32>
    %93 = tpu.reciprocal %92 {approx = true} : vector<1x1xf32> -> vector<1x1xf32>
    %cst_55 = arith.constant 8.000000e+00 : f32
    %94 = vector.broadcast %cst_55 : f32 to vector<1x1xf32>
    %95 = arith.mulf %94, %93 : vector<1x1xf32>
    %96 = vector.broadcast %95 : vector<1x1xf32> to vector<8x8xf32>
    %97 = arith.mulf %88, %96 : vector<8x8xf32>
    %98 = arith.addf %81, %97 : vector<8x8xf32>
    %cst_56 = arith.constant dense<0.000000e+00> : vector<8x32xf32>
    %99 = tpu.matmul %98, %37, %cst_56 {dimension_numbers = #tpu.dot_dimension_numbers<[1], [0], [0], [1], [0, 0, 1, 1], [], []>} : vector<8x8xf32>, vector<8x32xf32>, vector<8x32xf32> -> vector<8x32xf32>
    %100 = vector.extract_strided_slice %29 {offsets = [0, 32], sizes = [8, 32], strides = [1, 1]} : vector<8x128xf32> to vector<8x32xf32>
    %101 = vector.extract_strided_slice %34 {offsets = [0, 32], sizes = [8, 32], strides = [1, 1]} : vector<8x128xf32> to vector<8x32xf32>
    %102 = vector.extract_strided_slice %14 {offsets = [0, 32], sizes = [8, 32], strides = [1, 1]} : vector<8x128xf32> to vector<8x32xf32>
    %103 = vector.extract_strided_slice %19 {offsets = [0, 32], sizes = [8, 32], strides = [1, 1]} : vector<8x128xf32> to vector<8x32xf32>
    %104 = vector.extract_strided_slice %24 {offsets = [0, 32], sizes = [8, 32], strides = [1, 1]} : vector<8x128xf32> to vector<8x32xf32>
    %105 = tpu.concatenate %102, %103, %104 in 0 : vector<8x32xf32>, vector<8x32xf32>, vector<8x32xf32> -> vector<24x32xf32>
    %cst_57 = arith.constant dense<0.000000e+00> : vector<24x8xf32>
    %106 = tpu.matmul %105, %100, %cst_57 {dimension_numbers = #tpu.dot_dimension_numbers<[1], [1], [0], [0], [0, 0, 1, 0], [], []>} : vector<24x32xf32>, vector<8x32xf32>, vector<24x8xf32> -> vector<24x8xf32>
    %107 = vector.extract_strided_slice %106 {offsets = [0, 0], sizes = [8, 8], strides = [1, 1]} : vector<24x8xf32> to vector<8x8xf32>
    %108 = vector.extract_strided_slice %106 {offsets = [8, 0], sizes = [8, 8], strides = [1, 1]} : vector<24x8xf32> to vector<8x8xf32>
    %109 = vector.extract_strided_slice %106 {offsets = [16, 0], sizes = [8, 8], strides = [1, 1]} : vector<24x8xf32> to vector<8x8xf32>
    %110 = arith.addf %107, %35 : vector<8x8xf32>
    %111 = arith.addf %108, %35 : vector<8x8xf32>
    %112 = arith.addf %109, %35 : vector<8x8xf32>
    %cst_58 = arith.constant dense<0xFF800000> : vector<8xf32>
    %113 = vector.multi_reduction <maximumf>, %110, %cst_58 [1] : vector<8x8xf32> to vector<8xf32>
    %114 = vector.shape_cast %113 : vector<8xf32> to vector<8x1xf32>
    %cst_59 = arith.constant dense<0xFF800000> : vector<1xf32>
    %115 = vector.multi_reduction <maximumf>, %114, %cst_59 [0] : vector<8x1xf32> to vector<1xf32>
    %116 = vector.shape_cast %115 : vector<1xf32> to vector<1x1xf32>
    %117 = vector.broadcast %116 : vector<1x1xf32> to vector<8x8xf32>
    %118 = arith.subf %110, %117 : vector<8x8xf32>
    %119 = math.exp %118 : vector<8x8xf32>
    %cst_60 = arith.constant dense<0.000000e+00> : vector<8xf32>
    %120 = vector.multi_reduction <add>, %119, %cst_60 [1] : vector<8x8xf32> to vector<8xf32>
    %121 = vector.shape_cast %120 : vector<8xf32> to vector<8x1xf32>
    %cst_61 = arith.constant dense<0.000000e+00> : vector<1xf32>
    %122 = vector.multi_reduction <add>, %121, %cst_61 [0] : vector<8x1xf32> to vector<1xf32>
    %123 = vector.shape_cast %122 : vector<1xf32> to vector<1x1xf32>
    %124 = tpu.reciprocal %123 {approx = true} : vector<1x1xf32> -> vector<1x1xf32>
    %cst_62 = arith.constant 8.000000e+00 : f32
    %125 = vector.broadcast %cst_62 : f32 to vector<1x1xf32>
    %126 = arith.mulf %125, %124 : vector<1x1xf32>
    %127 = vector.broadcast %126 : vector<1x1xf32> to vector<8x8xf32>
    %128 = arith.mulf %119, %127 : vector<8x8xf32>
    %cst_63 = arith.constant dense<0xFF800000> : vector<8xf32>
    %129 = vector.multi_reduction <maximumf>, %111, %cst_63 [1] : vector<8x8xf32> to vector<8xf32>
    %130 = vector.shape_cast %129 : vector<8xf32> to vector<8x1xf32>
    %cst_64 = arith.constant dense<0xFF800000> : vector<1xf32>
    %131 = vector.multi_reduction <maximumf>, %130, %cst_64 [0] : vector<8x1xf32> to vector<1xf32>
    %132 = vector.shape_cast %131 : vector<1xf32> to vector<1x1xf32>
    %133 = vector.broadcast %132 : vector<1x1xf32> to vector<8x8xf32>
    %134 = arith.subf %111, %133 : vector<8x8xf32>
    %135 = math.exp %134 : vector<8x8xf32>
    %cst_65 = arith.constant dense<0.000000e+00> : vector<8xf32>
    %136 = vector.multi_reduction <add>, %135, %cst_65 [1] : vector<8x8xf32> to vector<8xf32>
    %137 = vector.shape_cast %136 : vector<8xf32> to vector<8x1xf32>
    %cst_66 = arith.constant dense<0.000000e+00> : vector<1xf32>
    %138 = vector.multi_reduction <add>, %137, %cst_66 [0] : vector<8x1xf32> to vector<1xf32>
    %139 = vector.shape_cast %138 : vector<1xf32> to vector<1x1xf32>
    %140 = tpu.reciprocal %139 {approx = true} : vector<1x1xf32> -> vector<1x1xf32>
    %cst_67 = arith.constant 8.000000e+00 : f32
    %141 = vector.broadcast %cst_67 : f32 to vector<1x1xf32>
    %142 = arith.mulf %141, %140 : vector<1x1xf32>
    %143 = vector.broadcast %142 : vector<1x1xf32> to vector<8x8xf32>
    %144 = arith.mulf %135, %143 : vector<8x8xf32>
    %145 = arith.addf %128, %144 : vector<8x8xf32>
    %cst_68 = arith.constant dense<0xFF800000> : vector<8xf32>
    %146 = vector.multi_reduction <maximumf>, %112, %cst_68 [1] : vector<8x8xf32> to vector<8xf32>
    %147 = vector.shape_cast %146 : vector<8xf32> to vector<8x1xf32>
    %cst_69 = arith.constant dense<0xFF800000> : vector<1xf32>
    %148 = vector.multi_reduction <maximumf>, %147, %cst_69 [0] : vector<8x1xf32> to vector<1xf32>
    %149 = vector.shape_cast %148 : vector<1xf32> to vector<1x1xf32>
    %150 = vector.broadcast %149 : vector<1x1xf32> to vector<8x8xf32>
    %151 = arith.subf %112, %150 : vector<8x8xf32>
    %152 = math.exp %151 : vector<8x8xf32>
    %cst_70 = arith.constant dense<0.000000e+00> : vector<8xf32>
    %153 = vector.multi_reduction <add>, %152, %cst_70 [1] : vector<8x8xf32> to vector<8xf32>
    %154 = vector.shape_cast %153 : vector<8xf32> to vector<8x1xf32>
    %cst_71 = arith.constant dense<0.000000e+00> : vector<1xf32>
    %155 = vector.multi_reduction <add>, %154, %cst_71 [0] : vector<8x1xf32> to vector<1xf32>
    %156 = vector.shape_cast %155 : vector<1xf32> to vector<1x1xf32>
    %157 = tpu.reciprocal %156 {approx = true} : vector<1x1xf32> -> vector<1x1xf32>
    %cst_72 = arith.constant 8.000000e+00 : f32
    %158 = vector.broadcast %cst_72 : f32 to vector<1x1xf32>
    %159 = arith.mulf %158, %157 : vector<1x1xf32>
    %160 = vector.broadcast %159 : vector<1x1xf32> to vector<8x8xf32>
    %161 = arith.mulf %152, %160 : vector<8x8xf32>
    %162 = arith.addf %145, %161 : vector<8x8xf32>
    %cst_73 = arith.constant dense<0.000000e+00> : vector<8x32xf32>
    %163 = tpu.matmul %162, %101, %cst_73 {dimension_numbers = #tpu.dot_dimension_numbers<[1], [0], [0], [1], [0, 0, 1, 1], [], []>} : vector<8x8xf32>, vector<8x32xf32>, vector<8x32xf32> -> vector<8x32xf32>
    %164 = vector.extract_strided_slice %29 {offsets = [0, 64], sizes = [8, 32], strides = [1, 1]} : vector<8x128xf32> to vector<8x32xf32>
    %165 = vector.extract_strided_slice %34 {offsets = [0, 64], sizes = [8, 32], strides = [1, 1]} : vector<8x128xf32> to vector<8x32xf32>
    %166 = vector.extract_strided_slice %14 {offsets = [0, 64], sizes = [8, 32], strides = [1, 1]} : vector<8x128xf32> to vector<8x32xf32>
    %167 = vector.extract_strided_slice %19 {offsets = [0, 64], sizes = [8, 32], strides = [1, 1]} : vector<8x128xf32> to vector<8x32xf32>
    %168 = vector.extract_strided_slice %24 {offsets = [0, 64], sizes = [8, 32], strides = [1, 1]} : vector<8x128xf32> to vector<8x32xf32>
    %169 = tpu.concatenate %166, %167, %168 in 0 : vector<8x32xf32>, vector<8x32xf32>, vector<8x32xf32> -> vector<24x32xf32>
    %cst_74 = arith.constant dense<0.000000e+00> : vector<24x8xf32>
    %170 = tpu.matmul %169, %164, %cst_74 {dimension_numbers = #tpu.dot_dimension_numbers<[1], [1], [0], [0], [0, 0, 1, 0], [], []>} : vector<24x32xf32>, vector<8x32xf32>, vector<24x8xf32> -> vector<24x8xf32>
    %171 = vector.extract_strided_slice %170 {offsets = [0, 0], sizes = [8, 8], strides = [1, 1]} : vector<24x8xf32> to vector<8x8xf32>
    %172 = vector.extract_strided_slice %170 {offsets = [8, 0], sizes = [8, 8], strides = [1, 1]} : vector<24x8xf32> to vector<8x8xf32>
    %173 = vector.extract_strided_slice %170 {offsets = [16, 0], sizes = [8, 8], strides = [1, 1]} : vector<24x8xf32> to vector<8x8xf32>
    %174 = arith.addf %171, %35 : vector<8x8xf32>
    %175 = arith.addf %172, %35 : vector<8x8xf32>
    %176 = arith.addf %173, %35 : vector<8x8xf32>
    %cst_75 = arith.constant dense<0xFF800000> : vector<8xf32>
    %177 = vector.multi_reduction <maximumf>, %174, %cst_75 [1] : vector<8x8xf32> to vector<8xf32>
    %178 = vector.shape_cast %177 : vector<8xf32> to vector<8x1xf32>
    %cst_76 = arith.constant dense<0xFF800000> : vector<1xf32>
    %179 = vector.multi_reduction <maximumf>, %178, %cst_76 [0] : vector<8x1xf32> to vector<1xf32>
    %180 = vector.shape_cast %179 : vector<1xf32> to vector<1x1xf32>
    %181 = vector.broadcast %180 : vector<1x1xf32> to vector<8x8xf32>
    %182 = arith.subf %174, %181 : vector<8x8xf32>
    %183 = math.exp %182 : vector<8x8xf32>
    %cst_77 = arith.constant dense<0.000000e+00> : vector<8xf32>
    %184 = vector.multi_reduction <add>, %183, %cst_77 [1] : vector<8x8xf32> to vector<8xf32>
    %185 = vector.shape_cast %184 : vector<8xf32> to vector<8x1xf32>
    %cst_78 = arith.constant dense<0.000000e+00> : vector<1xf32>
    %186 = vector.multi_reduction <add>, %185, %cst_78 [0] : vector<8x1xf32> to vector<1xf32>
    %187 = vector.shape_cast %186 : vector<1xf32> to vector<1x1xf32>
    %188 = tpu.reciprocal %187 {approx = true} : vector<1x1xf32> -> vector<1x1xf32>
    %cst_79 = arith.constant 8.000000e+00 : f32
    %189 = vector.broadcast %cst_79 : f32 to vector<1x1xf32>
    %190 = arith.mulf %189, %188 : vector<1x1xf32>
    %191 = vector.broadcast %190 : vector<1x1xf32> to vector<8x8xf32>
    %192 = arith.mulf %183, %191 : vector<8x8xf32>
    %cst_80 = arith.constant dense<0xFF800000> : vector<8xf32>
    %193 = vector.multi_reduction <maximumf>, %175, %cst_80 [1] : vector<8x8xf32> to vector<8xf32>
    %194 = vector.shape_cast %193 : vector<8xf32> to vector<8x1xf32>
    %cst_81 = arith.constant dense<0xFF800000> : vector<1xf32>
    %195 = vector.multi_reduction <maximumf>, %194, %cst_81 [0] : vector<8x1xf32> to vector<1xf32>
    %196 = vector.shape_cast %195 : vector<1xf32> to vector<1x1xf32>
    %197 = vector.broadcast %196 : vector<1x1xf32> to vector<8x8xf32>
    %198 = arith.subf %175, %197 : vector<8x8xf32>
    %199 = math.exp %198 : vector<8x8xf32>
    %cst_82 = arith.constant dense<0.000000e+00> : vector<8xf32>
    %200 = vector.multi_reduction <add>, %199, %cst_82 [1] : vector<8x8xf32> to vector<8xf32>
    %201 = vector.shape_cast %200 : vector<8xf32> to vector<8x1xf32>
    %cst_83 = arith.constant dense<0.000000e+00> : vector<1xf32>
    %202 = vector.multi_reduction <add>, %201, %cst_83 [0] : vector<8x1xf32> to vector<1xf32>
    %203 = vector.shape_cast %202 : vector<1xf32> to vector<1x1xf32>
    %204 = tpu.reciprocal %203 {approx = true} : vector<1x1xf32> -> vector<1x1xf32>
    %cst_84 = arith.constant 8.000000e+00 : f32
    %205 = vector.broadcast %cst_84 : f32 to vector<1x1xf32>
    %206 = arith.mulf %205, %204 : vector<1x1xf32>
    %207 = vector.broadcast %206 : vector<1x1xf32> to vector<8x8xf32>
    %208 = arith.mulf %199, %207 : vector<8x8xf32>
    %209 = arith.addf %192, %208 : vector<8x8xf32>
    %cst_85 = arith.constant dense<0xFF800000> : vector<8xf32>
    %210 = vector.multi_reduction <maximumf>, %176, %cst_85 [1] : vector<8x8xf32> to vector<8xf32>
    %211 = vector.shape_cast %210 : vector<8xf32> to vector<8x1xf32>
    %cst_86 = arith.constant dense<0xFF800000> : vector<1xf32>
    %212 = vector.multi_reduction <maximumf>, %211, %cst_86 [0] : vector<8x1xf32> to vector<1xf32>
    %213 = vector.shape_cast %212 : vector<1xf32> to vector<1x1xf32>
    %214 = vector.broadcast %213 : vector<1x1xf32> to vector<8x8xf32>
    %215 = arith.subf %176, %214 : vector<8x8xf32>
    %216 = math.exp %215 : vector<8x8xf32>
    %cst_87 = arith.constant dense<0.000000e+00> : vector<8xf32>
    %217 = vector.multi_reduction <add>, %216, %cst_87 [1] : vector<8x8xf32> to vector<8xf32>
    %218 = vector.shape_cast %217 : vector<8xf32> to vector<8x1xf32>
    %cst_88 = arith.constant dense<0.000000e+00> : vector<1xf32>
    %219 = vector.multi_reduction <add>, %218, %cst_88 [0] : vector<8x1xf32> to vector<1xf32>
    %220 = vector.shape_cast %219 : vector<1xf32> to vector<1x1xf32>
    %221 = tpu.reciprocal %220 {approx = true} : vector<1x1xf32> -> vector<1x1xf32>
    %cst_89 = arith.constant 8.000000e+00 : f32
    %222 = vector.broadcast %cst_89 : f32 to vector<1x1xf32>
    %223 = arith.mulf %222, %221 : vector<1x1xf32>
    %224 = vector.broadcast %223 : vector<1x1xf32> to vector<8x8xf32>
    %225 = arith.mulf %216, %224 : vector<8x8xf32>
    %226 = arith.addf %209, %225 : vector<8x8xf32>
    %cst_90 = arith.constant dense<0.000000e+00> : vector<8x32xf32>
    %227 = tpu.matmul %226, %165, %cst_90 {dimension_numbers = #tpu.dot_dimension_numbers<[1], [0], [0], [1], [0, 0, 1, 1], [], []>} : vector<8x8xf32>, vector<8x32xf32>, vector<8x32xf32> -> vector<8x32xf32>
    %228 = vector.extract_strided_slice %29 {offsets = [0, 96], sizes = [8, 32], strides = [1, 1]} : vector<8x128xf32> to vector<8x32xf32>
    %229 = vector.extract_strided_slice %34 {offsets = [0, 96], sizes = [8, 32], strides = [1, 1]} : vector<8x128xf32> to vector<8x32xf32>
    %230 = vector.extract_strided_slice %14 {offsets = [0, 96], sizes = [8, 32], strides = [1, 1]} : vector<8x128xf32> to vector<8x32xf32>
    %231 = vector.extract_strided_slice %19 {offsets = [0, 96], sizes = [8, 32], strides = [1, 1]} : vector<8x128xf32> to vector<8x32xf32>
    %232 = vector.extract_strided_slice %24 {offsets = [0, 96], sizes = [8, 32], strides = [1, 1]} : vector<8x128xf32> to vector<8x32xf32>
    %233 = tpu.concatenate %230, %231, %232 in 0 : vector<8x32xf32>, vector<8x32xf32>, vector<8x32xf32> -> vector<24x32xf32>
    %cst_91 = arith.constant dense<0.000000e+00> : vector<24x8xf32>
    %234 = tpu.matmul %233, %228, %cst_91 {dimension_numbers = #tpu.dot_dimension_numbers<[1], [1], [0], [0], [0, 0, 1, 0], [], []>} : vector<24x32xf32>, vector<8x32xf32>, vector<24x8xf32> -> vector<24x8xf32>
    %235 = vector.extract_strided_slice %234 {offsets = [0, 0], sizes = [8, 8], strides = [1, 1]} : vector<24x8xf32> to vector<8x8xf32>
    %236 = vector.extract_strided_slice %234 {offsets = [8, 0], sizes = [8, 8], strides = [1, 1]} : vector<24x8xf32> to vector<8x8xf32>
    %237 = vector.extract_strided_slice %234 {offsets = [16, 0], sizes = [8, 8], strides = [1, 1]} : vector<24x8xf32> to vector<8x8xf32>
    %238 = arith.addf %235, %35 : vector<8x8xf32>
    %239 = arith.addf %236, %35 : vector<8x8xf32>
    %240 = arith.addf %237, %35 : vector<8x8xf32>
    %cst_92 = arith.constant dense<0xFF800000> : vector<8xf32>
    %241 = vector.multi_reduction <maximumf>, %238, %cst_92 [1] : vector<8x8xf32> to vector<8xf32>
    %242 = vector.shape_cast %241 : vector<8xf32> to vector<8x1xf32>
    %cst_93 = arith.constant dense<0xFF800000> : vector<1xf32>
    %243 = vector.multi_reduction <maximumf>, %242, %cst_93 [0] : vector<8x1xf32> to vector<1xf32>
    %244 = vector.shape_cast %243 : vector<1xf32> to vector<1x1xf32>
    %245 = vector.broadcast %244 : vector<1x1xf32> to vector<8x8xf32>
    %246 = arith.subf %238, %245 : vector<8x8xf32>
    %247 = math.exp %246 : vector<8x8xf32>
    %cst_94 = arith.constant dense<0.000000e+00> : vector<8xf32>
    %248 = vector.multi_reduction <add>, %247, %cst_94 [1] : vector<8x8xf32> to vector<8xf32>
    %249 = vector.shape_cast %248 : vector<8xf32> to vector<8x1xf32>
    %cst_95 = arith.constant dense<0.000000e+00> : vector<1xf32>
    %250 = vector.multi_reduction <add>, %249, %cst_95 [0] : vector<8x1xf32> to vector<1xf32>
    %251 = vector.shape_cast %250 : vector<1xf32> to vector<1x1xf32>
    %252 = tpu.reciprocal %251 {approx = true} : vector<1x1xf32> -> vector<1x1xf32>
    %cst_96 = arith.constant 8.000000e+00 : f32
    %253 = vector.broadcast %cst_96 : f32 to vector<1x1xf32>
    %254 = arith.mulf %253, %252 : vector<1x1xf32>
    %255 = vector.broadcast %254 : vector<1x1xf32> to vector<8x8xf32>
    %256 = arith.mulf %247, %255 : vector<8x8xf32>
    %cst_97 = arith.constant dense<0xFF800000> : vector<8xf32>
    %257 = vector.multi_reduction <maximumf>, %239, %cst_97 [1] : vector<8x8xf32> to vector<8xf32>
    %258 = vector.shape_cast %257 : vector<8xf32> to vector<8x1xf32>
    %cst_98 = arith.constant dense<0xFF800000> : vector<1xf32>
    %259 = vector.multi_reduction <maximumf>, %258, %cst_98 [0] : vector<8x1xf32> to vector<1xf32>
    %260 = vector.shape_cast %259 : vector<1xf32> to vector<1x1xf32>
    %261 = vector.broadcast %260 : vector<1x1xf32> to vector<8x8xf32>
    %262 = arith.subf %239, %261 : vector<8x8xf32>
    %263 = math.exp %262 : vector<8x8xf32>
    %cst_99 = arith.constant dense<0.000000e+00> : vector<8xf32>
    %264 = vector.multi_reduction <add>, %263, %cst_99 [1] : vector<8x8xf32> to vector<8xf32>
    %265 = vector.shape_cast %264 : vector<8xf32> to vector<8x1xf32>
    %cst_100 = arith.constant dense<0.000000e+00> : vector<1xf32>
    %266 = vector.multi_reduction <add>, %265, %cst_100 [0] : vector<8x1xf32> to vector<1xf32>
    %267 = vector.shape_cast %266 : vector<1xf32> to vector<1x1xf32>
    %268 = tpu.reciprocal %267 {approx = true} : vector<1x1xf32> -> vector<1x1xf32>
    %cst_101 = arith.constant 8.000000e+00 : f32
    %269 = vector.broadcast %cst_101 : f32 to vector<1x1xf32>
    %270 = arith.mulf %269, %268 : vector<1x1xf32>
    %271 = vector.broadcast %270 : vector<1x1xf32> to vector<8x8xf32>
    %272 = arith.mulf %263, %271 : vector<8x8xf32>
    %273 = arith.addf %256, %272 : vector<8x8xf32>
    %cst_102 = arith.constant dense<0xFF800000> : vector<8xf32>
    %274 = vector.multi_reduction <maximumf>, %240, %cst_102 [1] : vector<8x8xf32> to vector<8xf32>
    %275 = vector.shape_cast %274 : vector<8xf32> to vector<8x1xf32>
    %cst_103 = arith.constant dense<0xFF800000> : vector<1xf32>
    %276 = vector.multi_reduction <maximumf>, %275, %cst_103 [0] : vector<8x1xf32> to vector<1xf32>
    %277 = vector.shape_cast %276 : vector<1xf32> to vector<1x1xf32>
    %278 = vector.broadcast %277 : vector<1x1xf32> to vector<8x8xf32>
    %279 = arith.subf %240, %278 : vector<8x8xf32>
    %280 = math.exp %279 : vector<8x8xf32>
    %cst_104 = arith.constant dense<0.000000e+00> : vector<8xf32>
    %281 = vector.multi_reduction <add>, %280, %cst_104 [1] : vector<8x8xf32> to vector<8xf32>
    %282 = vector.shape_cast %281 : vector<8xf32> to vector<8x1xf32>
    %cst_105 = arith.constant dense<0.000000e+00> : vector<1xf32>
    %283 = vector.multi_reduction <add>, %282, %cst_105 [0] : vector<8x1xf32> to vector<1xf32>
    %284 = vector.shape_cast %283 : vector<1xf32> to vector<1x1xf32>
    %285 = tpu.reciprocal %284 {approx = true} : vector<1x1xf32> -> vector<1x1xf32>
    %cst_106 = arith.constant 8.000000e+00 : f32
    %286 = vector.broadcast %cst_106 : f32 to vector<1x1xf32>
    %287 = arith.mulf %286, %285 : vector<1x1xf32>
    %288 = vector.broadcast %287 : vector<1x1xf32> to vector<8x8xf32>
    %289 = arith.mulf %280, %288 : vector<8x8xf32>
    %290 = arith.addf %273, %289 : vector<8x8xf32>
    %cst_107 = arith.constant dense<0.000000e+00> : vector<8x32xf32>
    %291 = tpu.matmul %290, %229, %cst_107 {dimension_numbers = #tpu.dot_dimension_numbers<[1], [0], [0], [1], [0, 0, 1, 1], [], []>} : vector<8x8xf32>, vector<8x32xf32>, vector<8x32xf32> -> vector<8x32xf32>
    %292 = tpu.concatenate %99, %163, %227, %291 in 1 : vector<8x32xf32>, vector<8x32xf32>, vector<8x32xf32>, vector<8x32xf32> -> vector<8x128xf32>
    %c0_108 = arith.constant 0 : index
    %c0_109 = arith.constant 0 : index
    %293 = vector.load %arg11[%c0_108, %c0_109] : memref<128x128xf32, #tpu.memory_space<vmem>>, vector<128x128xf32>
    %cst_110 = arith.constant dense<0.000000e+00> : vector<8x128xf32>
    %294 = tpu.matmul %292, %293, %cst_110 {dimension_numbers = #tpu.dot_dimension_numbers<[1], [0], [0], [1], [0, 0, 1, 1], [], []>} : vector<8x128xf32>, vector<128x128xf32>, vector<8x128xf32> -> vector<8x128xf32>
    %c0_111 = arith.constant 0 : index
    %c0_112 = arith.constant 0 : index
    %295 = vector.load %arg17[%c0_111, %c0_112] : memref<1x128xf32, #tpu.memory_space<vmem>>, vector<1x128xf32>
    %296 = vector.broadcast %295 : vector<1x128xf32> to vector<8x128xf32>
    %297 = arith.addf %294, %296 : vector<8x128xf32>
    %c0_113 = arith.constant 0 : index
    %c0_114 = arith.constant 0 : index
    %c0_115 = arith.constant 0 : index
    %298 = vector.load %arg19[%c0_113, %c0_114, %c0_115] : memref<1x8x128xf32, #tpu.memory_space<vmem>>, vector<1x8x128xf32>
    %299 = vector.shape_cast %298 : vector<1x8x128xf32> to vector<8x128xf32>
    %300 = vector.shape_cast %297 : vector<8x128xf32> to vector<1x8x128xf32>
    tpu.vector_store %arg19[%c0_113, %c0_114, %c0_115], %300 {strides = array<i32>} : memref<1x8x128xf32, #tpu.memory_space<vmem>>, vector<1x8x128xf32>,
    %301 = vector.shape_cast %64 : vector<8x8xf32> to vector<1x8x8xf32>
    %302 = vector.shape_cast %128 : vector<8x8xf32> to vector<1x8x8xf32>
    %303 = vector.shape_cast %192 : vector<8x8xf32> to vector<1x8x8xf32>
    %304 = vector.shape_cast %256 : vector<8x8xf32> to vector<1x8x8xf32>
    %305 = tpu.concatenate %301, %302, %303, %304 in 0 : vector<1x8x8xf32>, vector<1x8x8xf32>, vector<1x8x8xf32>, vector<1x8x8xf32> -> vector<4x8x8xf32>
    %c0_116 = arith.constant 0 : index
    %c0_117 = arith.constant 0 : index
    %c0_118 = arith.constant 0 : index
    %c0_119 = arith.constant 0 : index
    %306 = vector.load %arg20[%c0_116, %c0_117, %c0_118, %c0_119] : memref<1x4x8x8xf32, #tpu.memory_space<vmem>>, vector<1x4x8x8xf32>
    %307 = vector.shape_cast %306 : vector<1x4x8x8xf32> to vector<4x8x8xf32>
    %308 = vector.shape_cast %305 : vector<4x8x8xf32> to vector<1x4x8x8xf32>
    tpu.vector_store %arg20[%c0_116, %c0_117, %c0_118, %c0_119], %308 {strides = array<i32>} : memref<1x4x8x8xf32, #tpu.memory_space<vmem>>, vector<1x4x8x8xf32>,
    return
  }
  func.func @transform_0(%arg0: i32) -> (i32, i32, i32) {
    %c0_i32 = arith.constant 0 : i32
    %c0_i32_0 = arith.constant 0 : i32
    %c0_i32_1 = arith.constant 0 : i32
    return %arg0, %c0_i32, %c0_i32_0 : i32, i32, i32
  }
  func.func @transform_1(%arg0: i32) -> (i32, i32, i32) {
    %c0_i32 = arith.constant 0 : i32
    %c0_i32_0 = arith.constant 0 : i32
    %c0_i32_1 = arith.constant 0 : i32
    return %arg0, %c0_i32, %c0_i32_0 : i32, i32, i32
  }
  func.func @transform_2(%arg0: i32) -> (i32, i32, i32) {
    %c0_i32 = arith.constant 0 : i32
    %c0_i32_0 = arith.constant 0 : i32
    %c0_i32_1 = arith.constant 0 : i32
    return %arg0, %c0_i32, %c0_i32_0 : i32, i32, i32
  }
  func.func @transform_3(%arg0: i32) -> (i32, i32, i32) {
    %c0_i32 = arith.constant 0 : i32
    %c0_i32_0 = arith.constant 0 : i32
    %c0_i32_1 = arith.constant 0 : i32
    return %arg0, %c0_i32, %c0_i32_0 : i32, i32, i32
  }
  func.func @transform_4(%arg0: i32) -> (i32, i32, i32) {
    %c0_i32 = arith.constant 0 : i32
    %c0_i32_0 = arith.constant 0 : i32
    %c0_i32_1 = arith.constant 0 : i32
    return %arg0, %c0_i32, %c0_i32_0 : i32, i32, i32
  }
  func.func @transform_5(%arg0: i32) -> (i32, i32) {
    %c0_i32 = arith.constant 0 : i32
    %c0_i32_0 = arith.constant 0 : i32
    %c0_i32_1 = arith.constant 0 : i32
    return %c0_i32, %c0_i32_0 : i32, i32
  }
  func.func @transform_6(%arg0: i32) -> (i32, i32) {
    %c0_i32 = arith.constant 0 : i32
    %c0_i32_0 = arith.constant 0 : i32
    %c0_i32_1 = arith.constant 0 : i32
    return %c0_i32, %c0_i32_0 : i32, i32
  }
  func.func @transform_7(%arg0: i32) -> (i32, i32) {
    %c0_i32 = arith.constant 0 : i32
    %c0_i32_0 = arith.constant 0 : i32
    %c0_i32_1 = arith.constant 0 : i32
    return %c0_i32, %c0_i32_0 : i32, i32
  }
  func.func @transform_8(%arg0: i32) -> (i32, i32) {
    %c0_i32 = arith.constant 0 : i32
    %c0_i32_0 = arith.constant 0 : i32
    %c0_i32_1 = arith.constant 0 : i32
    return %c0_i32, %c0_i32_0 : i32, i32
  }
  func.func @transform_9(%arg0: i32) -> (i32, i32) {
    %c0_i32 = arith.constant 0 : i32
    %c0_i32_0 = arith.constant 0 : i32
    %c0_i32_1 = arith.constant 0 : i32
    return %c0_i32, %c0_i32_0 : i32, i32
  }
  func.func @transform_10(%arg0: i32) -> (i32, i32) {
    %c0_i32 = arith.constant 0 : i32
    %c0_i32_0 = arith.constant 0 : i32
    %c0_i32_1 = arith.constant 0 : i32
    return %c0_i32, %c0_i32_0 : i32, i32
  }
  func.func @transform_11(%arg0: i32) -> (i32, i32) {
    %c0_i32 = arith.constant 0 : i32
    %c0_i32_0 = arith.constant 0 : i32
    %c0_i32_1 = arith.constant 0 : i32
    return %c0_i32, %c0_i32_0 : i32, i32
  }
  func.func @transform_12(%arg0: i32) -> (i32, i32) {
    %c0_i32 = arith.constant 0 : i32
    %c0_i32_0 = arith.constant 0 : i32
    %c0_i32_1 = arith.constant 0 : i32
    return %c0_i32, %c0_i32_0 : i32, i32
  }
  func.func @transform_13(%arg0: i32) -> (i32, i32) {
    %c0_i32 = arith.constant 0 : i32
    %c0_i32_0 = arith.constant 0 : i32
    %c0_i32_1 = arith.constant 0 : i32
    return %c0_i32, %c0_i32_0 : i32, i32
  }
  func.func @transform_14(%arg0: i32) -> (i32, i32) {
    %c0_i32 = arith.constant 0 : i32
    %c0_i32_0 = arith.constant 0 : i32
    %c0_i32_1 = arith.constant 0 : i32
    return %c0_i32, %c0_i32_0 : i32, i32
  }
  func.func @transform_15(%arg0: i32) -> (i32, i32) {
    %c0_i32 = arith.constant 0 : i32
    %c0_i32_0 = arith.constant 0 : i32
    %c0_i32_1 = arith.constant 0 : i32
    return %c0_i32, %c0_i32_0 : i32, i32
  }
  func.func @transform_16(%arg0: i32) -> (i32, i32) {
    %c0_i32 = arith.constant 0 : i32
    %c0_i32_0 = arith.constant 0 : i32
    %c0_i32_1 = arith.constant 0 : i32
    return %c0_i32, %c0_i32_0 : i32, i32
  }
  func.func @transform_17(%arg0: i32) -> (i32, i32) {
    %c0_i32 = arith.constant 0 : i32
    %c0_i32_0 = arith.constant 0 : i32
    %c0_i32_1 = arith.constant 0 : i32
    return %c0_i32, %c0_i32_0 : i32, i32
  }
  func.func @transform_18(%arg0: i32) -> (i32, i32, i32) {
    %c0_i32 = arith.constant 0 : i32
    %c0_i32_0 = arith.constant 0 : i32
    %c0_i32_1 = arith.constant 0 : i32
    return %arg0, %c0_i32, %c0_i32_0 : i32, i32, i32
  }
  func.func @transform_19(%arg0: i32) -> (i32, i32, i32, i32) {
    %c0_i32 = arith.constant 0 : i32
    %c0_i32_0 = arith.constant 0 : i32
    %c0_i32_1 = arith.constant 0 : i32
    %c0_i32_2 = arith.constant 0 : i32
    return %arg0, %c0_i32, %c0_i32_0, %c0_i32_1 : i32, i32, i32, i32
  }
}

</mosaic_0001>

<bundles_post_ra>
// kernel: tpu_custom_call.1
= control target key start
LH: loop header
LB: loop body
LE: loop exit
PB: predicated region body
PF: predicated region fallthrough
CT: control target
= control target key end

     0   :  { %s4892_s0 = inlined_call_operand.hbm [shape: f32[2,8,128], index: 0, kind: input, shape index: {}]   ;;  %s4893_s1 = inlined_call_operand.hbm [shape: f32[2,8,128], index: 1, kind: input, shape index: {}]   ;;  %s4894_s2 = inlined_call_operand.hbm [shape: f32[2,8,128], index: 2, kind: input, shape index: {}]   ;;  %s4895_s3 = inlined_call_operand.hbm [shape: f32[2,8,128], index: 3, kind: input, shape index: {}]   ;;  %s4896_s4 = inlined_call_operand.hbm [shape: f32[2,8,128], index: 4, kind: input, shape index: {}]   ;;  %s4897_s5 = inlined_call_operand.hbm [shape: f32[128,128], index: 5, kind: input, shape index: {}]   ;;  %s4898_s6 = inlined_call_operand.hbm [shape: f32[128,128], index: 6, kind: input, shape index: {}]   ;;  %s4899_s7 = inlined_call_operand.hbm [shape: f32[128,128], index: 7, kind: input, shape index: {}]   ;;  %s4900_s8 = inlined_call_operand.hbm [shape: f32[128,128], index: 8, kind: input, shape index: {}]   ;;  %s4901_s9 = inlined_call_operand.hbm [shape: f32[128,128], index: 9, kind: input, shape index: {}]   ;;  %s4902_s10 = inlined_call_operand.hbm [shape: f32[128,128], index: 10, kind: input, shape index: {}]   ;;  %s4903_s11 = inlined_call_operand.vmem [shape: f32[1,128], index: 11, kind: input, shape index: {}]   ;;  %s4904_s12 = inlined_call_operand.vmem [shape: f32[1,128], index: 12, kind: input, shape index: {}]   ;;  %s4905_s13 = inlined_call_operand.vmem [shape: f32[1,128], index: 13, kind: input, shape index: {}]   ;;  %s4906_s14 = inlined_call_operand.vmem [shape: f32[1,128], index: 14, kind: input, shape index: {}]   ;;  %s4907_s15 = inlined_call_operand.vmem [shape: f32[1,128], index: 15, kind: input, shape index: {}]   ;;  %s4908_s16 = inlined_call_operand.vmem [shape: f32[1,128], index: 16, kind: input, shape index: {}]   ;;  %s4909_s17 = inlined_call_operand.vmem [shape: f32[8,8], index: 17, kind: input, shape index: {}]   ;;  %s4910_s18 = inlined_call_operand.hbm [shape: f32[2,8,128], index: 18, kind: output, shape index: {0}]   ;;  %s4911_s19 = inlined_call_operand.hbm [shape: f32[2,4,8,8], index: 19, kind: output, shape index: {1}]  }
   0x1   :  { %4947 = sst [smem:[#allocation38_spill]] %s4892_s0 }
   0x2   :  { %4948 = sst [smem:[#allocation39_spill]] %s4893_s1 }
   0x3   :  { %4949 = sst [smem:[#allocation40_spill]] %s4894_s2 }
   0x4   :  { %4950 = sst [smem:[#allocation41_spill]] %s4895_s3 }
   0x5   :  { %4951 = sst [smem:[#allocation42_spill]] %s4897_s5 }
   0x6   :  { %4952 = sst [smem:[#allocation43_spill]] %s4899_s7 }
   0x7   :  { %4953 = sst [smem:[#allocation44_spill]] %s4901_s9 }
   0x8   :  { %4954 = sst [smem:[#allocation45_spill]] %s4903_s11 }
   0x9   :  { %4955 = sst [smem:[#allocation46_spill]] %s4904_s12 }
   0xa   :  { %4956 = sst [smem:[#allocation47_spill]] %s4905_s13 }
   0xb   :  { %4957 = sst [smem:[#allocation48_spill]] %s4906_s14 }
   0xc   :  { %4958 = sst [smem:[#allocation49_spill]] %s4907_s15 }
   0xd   :  { %4959 = sst [smem:[#allocation50_spill]] %s4908_s16 }
   0xe   :  { %4960 = sst [smem:[#allocation51_spill]] %s4909_s17 }
   0xf   :  { %4961 = sst [smem:[#allocation52_spill]] %s4910_s18 }
  0x10   :  { %4962 = sst [smem:[#allocation53_spill]] %s4911_s19 }
  0x11   :  { %25 = vsyncpa [#allocation3], 0 }
  0x12   :  { %27 = vsyncpa [#allocation3 + $0x1], 0 }
  0x13   :  { %28 = vsyncpa [#allocation6], 0 }
  0x14   :  { %30 = vsyncpa [#allocation6 + $0x1], 0 }
  0x15   :  { %31 = vsyncpa [#allocation9], 0 }
  0x16   :  { %33 = vsyncpa [#allocation9 + $0x1], 0 }
  0x17   :  { %34 = vsyncpa [#allocation12], 0 }
  0x18   :  { %35 = vsyncpa [#allocation15], 0 }
  0x19   :  { %36 = vsyncpa [#allocation18], 0 }
  0x1a   :  { %37 = vsyncpa [#allocation4], 0 }
  0x1b   :  { %39 = vsyncpa [#allocation4 + $0x1], 0 }
  0x1c   :  { %40 = vsyncpa [#allocation22], 0 }
  0x1d   :  { %42 = vsyncpa [#allocation22 + $0x1], 0  ;;  %s4078_s0 = smov 0   ;;  %s4080_s30 = smov 0  }
  0x1e   :  { %s4082_s20 = smov 0   ;;  %s4084_s21 = smov 0  }
  0x1f LB: > { %4963 = sst [smem:[#allocation31_spill]] %s3941_s0  ;;  %s3955_s1 = smov [#allocation11]   ;;  %s3953_s21 = sphi %s4084_s21, %s5021_s21   ;;  %s3949_s20 = sphi %s4082_s20, %s5025_s20   ;;  %s3945_s30 = sphi %s4080_s30, %s5024_s30   ;;  %s3941_s0 = sphi %s4078_s0, %s5023_s0  }
  0x20   : > { %4964 = sst [smem:[#allocation32_spill]] %s3953_s21  ;;  %s520_s22 = sshll.u32 %s3955_s1, 4  ;;  %s4104_s22 = int_to_ptr.vmem [resolvable:$true] %s520_s22 }
  0x21   : > { %s4099_s2 = sadd.s32 4294967295, %s3953_s21   ;;  %p2717_p0 = scmp.ge.s32.totalorder %s3953_s21, 1 }
  0x22   : > { %4965 = sst [smem:[#allocation33_spill]] %s4099_s2  ;;  %p4927_p1 = scmp.eq.s32.totalorder %s4099_s2, 0 }
  0x23   : > { %p508_p2 = scmp.lt.s32.totalorder %s3953_s21, 3  ;;  %s3956_s24 = smov [#allocation14]  }
  0x24   : > { %s546_s25 = sshll.u32 %s3956_s24, 4  ;;  %s3957_s26 = smov [#allocation17]   ;;  %s4119_s25 = int_to_ptr.vmem [resolvable:$true] %s546_s25 }
  0x25   : > { %p4106_p3 = pnand %p2717_p0, %p508_p2  ;;  %s572_s27 = sshll.u32 %s3957_s26, 4  ;;  %s4121_s27 = int_to_ptr.vmem [resolvable:$true] %s572_s27 }
  0x26   : > { %s4968_s5 = sld [smem:[#allocation42_spill]] }
  0x27   : > { %s4966_s23 = scalar_select %p4106_p3, 1, 0 }
  0x28   : > { %p3365_p5 = pneg %p4106_p3 }
  0x2a   : > { %p4115_p6 = pnand %p3365_p5, %p4927_p1 }
  0x2c   : > { %s4967_s3 = scalar_select %p4115_p6, 1, 0 }
  0x2d   : > { %s3517_s1 = scalar_lea.hbm %s4968_s5, 2048  ;;  %p4131_p8 = pneg %p4115_p6 }
  0x2e   : > { %p3518_p7 = scmp.ne.s32.totalorder %s4968_s5, %s3517_s1  ;;  %p3524_p11 = scmp.lt.u32.totalorder %s3517_s1, %s4968_s5 }
  0x2f   : > { %s4969_s24 = scalar_select %p4131_p8, 1, 0 }
  0x30   : > { %p3520_p9 = pnand %p4131_p8, %p3518_p7 }
  0x32   : > { %p3521_p10 = pneg %p3520_p9 }
  0x34   : > { %p3526_p12 = pnand %p3524_p11, %p3521_p10 }
  0x36   : > { %3529 = shalt.err (!%p3526_p12)
}
  0x37   : > { %s3530_s16 = scalar_lea.vmem %s4104_s22, 2048  ;;  %p3538_p5 = scmp.lt.s32.totalorder %s4104_s22, %s4104_s22 }
  0x38   : > { %p3531_p13 = scmp.ne.s32.totalorder %s4104_s22, %s3530_s16  ;;  %p3539_p4 = scmp.lt.s32.totalorder %s3530_s16, %s3530_s16 }
  0x3a   : > { %p3533_p0 = pnand %p3531_p13, %p4131_p8  ;;  %p3540_p7 = por %p3539_p4, %p3538_p5 }
  0x3c   : > { %p3534_p2 = pneg %p3533_p0 }
  0x3e   : > { %p3541_p9 = pnand %p3540_p7, %p3534_p2 }
  0x40   : > { %3544 = shalt.err (!%p3541_p9)
}
  0x41   : > { %s4919_s18 = smov 128   ;;  %s4921_s19 = smov 8  }
  0x42   : > { %3368 = dma.hbm_to_vmem [thread:$0]  (!%p4115_p6), %s4968_s5, 2048, %s4104_s22, [#allocation12], %s4919_s18, %s4919_s18, %s4921_s19  }
  0x43   : > { %s4970_s7 = sld [smem:[#allocation43_spill]] }
  0x49   : > { %s3545_s16 = scalar_lea.hbm %s4970_s7, 2048 }
  0x4a   : > { %p3546_p4 = scmp.ne.s32.totalorder %s4970_s7, %s3545_s16  ;;  %p3552_p12 = scmp.lt.u32.totalorder %s3545_s16, %s4970_s7 }
  0x4c   : > { %p3548_p10 = pnand %p3546_p4, %p4131_p8 }
  0x4e   : > { %p3549_p11 = pneg %p3548_p10 }
  0x50   : > { %p3554_p13 = pnand %p3552_p12, %p3549_p11 }
  0x52   : > { %3557 = shalt.err (!%p3554_p13)
}
  0x53   : > { %s3558_s22 = scalar_lea.vmem %s4119_s25, 2048  ;;  %p3566_p7 = scmp.lt.s32.totalorder %s4119_s25, %s4119_s25 }
  0x54   : > { %p3559_p0 = scmp.ne.s32.totalorder %s4119_s25, %s3558_s22  ;;  %p3567_p9 = scmp.lt.s32.totalorder %s3558_s22, %s3558_s22 }
  0x56   : > { %p3561_p2 = pnand %p3559_p0, %p4131_p8  ;;  %p3568_p4 = por %p3567_p9, %p3566_p7 }
  0x58   : > { %p3562_p5 = pneg %p3561_p2 }
  0x5a   : > { %p3569_p10 = pnand %p3568_p4, %p3562_p5 }
  0x5c   : > { %3572 = shalt.err (!%p3569_p10)
}
  0x5d   : > { %3374 = dma.hbm_to_vmem [thread:$0]  (!%p4115_p6), %s4970_s7, 2048, %s4119_s25, [#allocation15], %s4919_s18, %s4919_s18, %s4921_s19  }
  0x5e   : > { %s4971_s9 = sld [smem:[#allocation44_spill]] }
  0x64   : > { %s3573_s28 = scalar_lea.hbm %s4971_s9, 2048 }
  0x65   : > { %p3574_p11 = scmp.ne.s32.totalorder %s4971_s9, %s3573_s28  ;;  %p3580_p0 = scmp.lt.u32.totalorder %s3573_s28, %s4971_s9 }
  0x67   : > { %p3576_p12 = pnand %p3574_p11, %p4131_p8 }
  0x69   : > { %p3577_p13 = pneg %p3576_p12 }
  0x6b   : > { %p3582_p2 = pnand %p3580_p0, %p3577_p13 }
  0x6d   : > { %3585 = shalt.err (!%p3582_p2)
}
  0x6e   : > { %s3586_s25 = scalar_lea.vmem %s4121_s27, 2048  ;;  %p3594_p4 = scmp.lt.s32.totalorder %s4121_s27, %s4121_s27 }
  0x6f   : > { %p3587_p5 = scmp.ne.s32.totalorder %s4121_s27, %s3586_s25  ;;  %p3595_p10 = scmp.lt.s32.totalorder %s3586_s25, %s3586_s25 }
  0x71   : > { %p3589_p7 = pnand %p3587_p5, %p4131_p8  ;;  %p3596_p11 = por %p3595_p10, %p3594_p4 }
  0x73   : > { %p3590_p9 = pneg %p3589_p7 }
  0x75   : > { %p3597_p12 = pnand %p3596_p11, %p3590_p9 }
  0x77   : > { %3600 = shalt.err (!%p3597_p12)
}
  0x78   : > { %3380 = dma.hbm_to_vmem [thread:$0]  (!%p4115_p6), %s4971_s9, 2048, %s4121_s27, [#allocation18], %s4919_s18, %s4919_s18, %s4921_s19  }
  0x79   : > { %s2716_s13 = sadd.s32 4294967294, %s3953_s21   ;;  %s4209_s15 = sadd.s32 1, %s3953_s21  }
  0x7a   : > { %4972 = sst [smem:[#allocation34_spill]] %s4209_s15  ;;  %s55_s17 = sadd.s32 1, %s3949_s20 }
  0x7b   : > { %s52_s28 = ssub.s32 %s3953_s21, %s4209_s15  ;;  %p62_p13 = scmp.ne.s32.totalorder %s3949_s20, %s3945_s30 }
  0x7c   : > { %p53_p0 = scmp.eq.s32.totalorder %s52_s28, 0  ;;  %p63_p2 = scmp.eq.s32.totalorder %s3953_s21, 0 }
  0x7d   : > { %p68_p5 = scmp.ne.s32.totalorder %s3945_s30, %s3941_s0  ;;  %p469_p7 = scmp.eq.s32.totalorder %s4099_s2, 1 }
  0x7e   : > { %s4221_s29 = scalar_select %p53_p0, %s3949_s20, %s55_s17  }
  0x7f   : > { %p64_p9 = por %p63_p2, %p62_p13  ;;  %p4225_p4 = por %p4927_p1, %p68_p5 }
  0x80   : > { %4973 = sst [smem:[#allocation35_spill]] %s4221_s29  ;;  %p4229_p10 = por %p469_p7, %p62_p13 }
  0x81   : > { %s4974_s27 = scalar_select %p4225_p4, 1, 0 }
  0x82   : > { %s4975_s1 = scalar_select %p4229_p10, 1, 0 }
  0x83   : > { %p475_p11 = scmp.eq.s32.totalorder %s2716_s13, 1  ;;  %p3413_p12 = scmp.lt.s32.totalorder %s3953_s21, 2 }
  0x84   : > { %4976 = sst [smem:[#allocation36_spill]] %s4975_s1  ;;  %s4923_s26 = sand.u32 1, %s3949_s20  }
  0x85   : > { %p4235_p3 = por %p475_p11, %p68_p5  ;;  %s4241_s25 = sshll.u32 %s4923_s26, 3 }
  0x86   : > { %s4244_s22 = sshll.u32 %s3953_s21, 7  ;;  %p4246_p0 = pnand %p3413_p12, %p64_p9 }
  0x87   : > { %s4977_s16 = scalar_select %p4235_p3, 1, 0 }
  0x88   : > { %s4979_s12 = scalar_select %p4246_p0, 1, 0 }
  0x89   : > { %4978 = sst [smem:[#allocation37_spill]] %s4977_s16  ;;  %s4929_s17 = sand.u32 1, %s3953_s21  }
  0x8a   : > { %s4980_s18 = sld [smem:[#allocation39_spill]]  ;;  %s642_s26 = scalar_lea.vmem [#allocation5], %s4241_s25 }
  0x8b   : > { %s649_s5 = sshll.u32 %s642_s26, 4  ;;  %s4262_s7 = scalar_lea.sflag [#allocation6], %s4929_s17  ;;  %s4258_s5 = int_to_ptr.vmem [resolvable:$true] %s649_s5 }
  0x8c   : > { %p4268_p2 = pneg %p4246_p0 }
  0x8e   : > { %s4981_s29 = scalar_select %p4268_p2, 1, 0 }
  0x90   : > { %s4255_s19 = scalar_lea.hbm %s4980_s18, %s4244_s22  ;;  %s3606_s26 = scalar_lea.hbm %s4980_s18, 256 }
  0x91   : > { %s3601_s9 = scalar_lea.hbm %s4255_s19, 128  ;;  %p3607_p9 = scmp.lt.u32.totalorder %s4255_s19, %s4980_s18 }
  0x92   : > { %p3602_p13 = scmp.ne.s32.totalorder %s4255_s19, %s3601_s9  ;;  %p3608_p11 = scmp.lt.u32.totalorder %s3606_s26, %s3601_s9 }
  0x93   : > { %p3610_p1 = scmp.lt.u32.totalorder %s3601_s9, %s4255_s19 }
  0x94   : > { %p3604_p5 = pnand %p4268_p2, %p3602_p13  ;;  %p3609_p12 = por %p3608_p11, %p3607_p9 }
  0x96   : > { %p3605_p7 = pneg %p3604_p5  ;;  %p3611_p3 = por %p3610_p1, %p3609_p12 }
  0x98   : > { %p3612_p10 = pnand %p3611_p3, %p3605_p7 }
  0x9a   : > { %3615 = shalt.err (!%p3612_p10)
}
  0x9b   : > { %s3616_s17 = scalar_lea.vmem %s4258_s5, 128  ;;  %s3960_s13 = smov [#allocation5]  }
  0x9c   : > { %p3617_p13 = scmp.ne.s32.totalorder %s4258_s5, %s3616_s17  ;;  %s3621_s28 = sshll.u32 %s3960_s13, 4  ;;  %s3622_s28 = int_to_ptr.vmem [resolvable:$false] %s3621_s28 }
  0x9d   : > { %s3623_s15 = scalar_lea.vmem %s3622_s28, 256  ;;  %p3624_p6 = scmp.lt.s32.totalorder %s4258_s5, %s3622_s28 }
  0x9e   : > { %p3619_p5 = pnand %p3617_p13, %p4268_p2  ;;  %p3625_p8 = scmp.lt.s32.totalorder %s3623_s15, %s3616_s17 }
  0xa0   : > { %p3620_p4 = pneg %p3619_p5  ;;  %p3626_p9 = por %p3625_p8, %p3624_p6 }
  0xa2   : > { %p3627_p11 = pnand %p3626_p9, %p3620_p4 }
  0xa4   : > { %3630 = shalt.err (!%p3627_p11)
}
  0xa5   : > { %3390 = dma.hbm_to_vmem [thread:$0]  (!%p4246_p0), %s4255_s19, 128, %s4258_s5, %s4262_s7  }
  0xa6   : > { %s4982_s26 = sld [smem:[#allocation41_spill]]  ;;  %s678_s17 = scalar_lea.vmem [#allocation8], %s4241_s25 }
  0xa7   : > { %s685_s28 = sshll.u32 %s678_s17, 4  ;;  %s3961_s15 = smov [#allocation13]   ;;  %s4299_s28 = int_to_ptr.vmem [resolvable:$true] %s685_s28 }
  0xa8   : > { %s4301_s18 = sshll.u32 %s3961_s15, 4  ;;  %s4983_s0 = sand.u32 1, %s3953_s21   ;;  %s534_s18 = int_to_ptr.vmem [resolvable:$true] %s4301_s18 }
  0xa9   : > { %s4305_s1 = scalar_lea.sflag [#allocation9], %s4983_s0 }
  0xac   : > { %s4296_s13 = scalar_lea.hbm %s4982_s26, %s4244_s22  ;;  %s3636_s16 = scalar_lea.hbm %s4982_s26, 256 }
  0xad   : > { %s3631_s5 = scalar_lea.hbm %s4296_s13, 128  ;;  %p3637_p8 = scmp.lt.u32.totalorder %s4296_s13, %s4982_s26 }
  0xae   : > { %p3632_p1 = scmp.ne.s32.totalorder %s4296_s13, %s3631_s5  ;;  %p3638_p4 = scmp.lt.u32.totalorder %s3636_s16, %s3631_s5 }
  0xaf   : > { %p3640_p7 = scmp.lt.u32.totalorder %s3631_s5, %s4296_s13 }
  0xb0   : > { %p3634_p3 = pnand %p3632_p1, %p4268_p2  ;;  %p3639_p10 = por %p3638_p4, %p3637_p8 }
  0xb2   : > { %p3635_p6 = pneg %p3634_p3  ;;  %p3641_p12 = por %p3640_p7, %p3639_p10 }
  0xb4   : > { %p3642_p13 = pnand %p3641_p12, %p3635_p6 }
  0xb6   : > { %3645 = shalt.err (!%p3642_p13)
}
  0xb7   : > { %s3646_s0 = scalar_lea.vmem %s4299_s28, 128  ;;  %s3962_s17 = smov [#allocation8]  }
  0xb8   : > { %p3647_p5 = scmp.ne.s32.totalorder %s4299_s28, %s3646_s0  ;;  %s3651_s15 = sshll.u32 %s3962_s17, 4  ;;  %s3652_s15 = int_to_ptr.vmem [resolvable:$false] %s3651_s15 }
  0xb9   : > { %s3653_s11 = scalar_lea.vmem %s3652_s15, 256  ;;  %p3654_p1 = scmp.lt.s32.totalorder %s4299_s28, %s3652_s15 }
  0xba   : > { %p3649_p9 = pnand %p3647_p5, %p4268_p2  ;;  %p3655_p3 = scmp.lt.s32.totalorder %s3653_s11, %s3646_s0 }
  0xbc   : > { %p3650_p11 = pneg %p3649_p9  ;;  %p3656_p8 = por %p3655_p3, %p3654_p1 }
  0xbe   : > { %p3657_p4 = pnand %p3656_p8, %p3650_p11 }
  0xc0   : > { %3660 = shalt.err (!%p3657_p4)
}
  0xc1   : > { %3396 = dma.hbm_to_vmem [thread:$0]  (!%p4246_p0), %s4296_s13, 128, %s4299_s28, %s4305_s1  }
  0xc2   : > { %s3661_s19 = scalar_lea.hbm %s4898_s6, 2048  ;;  %p4984_p10 = scmp.ne.s32.totalorder %s4969_s24, 0 }
  0xc3   : > { %p3662_p6 = scmp.ne.s32.totalorder %s4898_s6, %s3661_s19  ;;  %p3668_p13 = scmp.lt.u32.totalorder %s3661_s19, %s4898_s6 }
  0xc5   : > { %p3664_p7 = pnand %p3662_p6, %p4984_p10 }
  0xc7   : > { %p3665_p12 = pneg %p3664_p7 }
  0xc9   : > { %p3670_p5 = pnand %p3668_p13, %p3665_p12 }
  0xcb   : > { %3673 = shalt.err (!%p3670_p5)
}
  0xcc   : > { %s3674_s15 = scalar_lea.vmem %s534_s18, 2048  ;;  %p3682_p3 = scmp.lt.s32.totalorder %s534_s18, %s534_s18 }
  0xcd   : > { %p3675_p9 = scmp.ne.s32.totalorder %s534_s18, %s3674_s15  ;;  %p3683_p8 = scmp.lt.s32.totalorder %s3674_s15, %s3674_s15 }
  0xcf   : > { %p3677_p11 = pnand %p3675_p9, %p4984_p10  ;;  %p3684_p4 = por %p3683_p8, %p3682_p3 }
  0xd1   : > { %p3678_p1 = pneg %p3677_p11 }
  0xd3   : > { %p3685_p0 = pnand %p3684_p4, %p3678_p1 }
  0xd5   : > { %3688 = shalt.err (!%p3685_p0)
}
  0xd6   : > { %p4985_p6 = scmp.ne.s32.totalorder %s4967_s3, 0  ;;  %s4986_s13 = smov 8  }
  0xd7   : > { %s4987_s28 = smov 128   ;;  %s3963_s5 = smov [#allocation16]  }
  0xd8   : > { %3371 = dma.hbm_to_vmem [thread:$0]  (!%p4985_p6), %s4898_s6, 2048, %s534_s18, [#allocation12], %s4987_s28, %s4987_s28, %s4986_s13  }
  0xd9   : > { %s559_s19 = sshll.u32 %s3963_s5, 4  ;;  %s3964_s9 = smov [#allocation19]   ;;  %s560_s19 = int_to_ptr.vmem [resolvable:$true] %s559_s19 }
  0xda   : > { %s585_s16 = sshll.u32 %s3964_s9, 4  ;;  %s3689_s15 = scalar_lea.hbm %s4900_s8, 2048  ;;  %s586_s16 = int_to_ptr.vmem [resolvable:$true] %s585_s16 }
  0xdb   : > { %p3690_p0 = scmp.ne.s32.totalorder %s4900_s8, %s3689_s15  ;;  %p3696_p13 = scmp.lt.u32.totalorder %s3689_s15, %s4900_s8 }
  0xdd   : > { %p3692_p7 = pnand %p3690_p0, %p4984_p10 }
  0xdf   : > { %p3693_p12 = pneg %p3692_p7 }
  0xe1   : > { %p3698_p5 = pnand %p3696_p13, %p3693_p12 }
  0xe3   : > { %3701 = shalt.err (!%p3698_p5)
}
  0xe4   : > { %s3702_s18 = scalar_lea.vmem %s560_s19, 2048  ;;  %p3710_p3 = scmp.lt.s32.totalorder %s560_s19, %s560_s19 }
  0xe5   : > { %p3703_p9 = scmp.ne.s32.totalorder %s560_s19, %s3702_s18  ;;  %p3711_p8 = scmp.lt.s32.totalorder %s3702_s18, %s3702_s18 }
  0xe7   : > { %p3705_p11 = pnand %p3703_p9, %p4984_p10  ;;  %p3712_p4 = por %p3711_p8, %p3710_p3 }
  0xe9   : > { %p3706_p1 = pneg %p3705_p11 }
  0xeb   : > { %p3713_p2 = pnand %p3712_p4, %p3706_p1 }
  0xed   : > { %3716 = shalt.err (!%p3713_p2)
}
  0xee   : > { %3377 = dma.hbm_to_vmem [thread:$0]  (!%p4985_p6), %s4900_s8, 2048, %s560_s19, [#allocation15], %s4987_s28, %s4987_s28, %s4986_s13  }
  0xef   : > { %s3717_s5 = scalar_lea.hbm %s4902_s10, 2048 }
  0xf0   : > { %p3718_p0 = scmp.ne.s32.totalorder %s4902_s10, %s3717_s5  ;;  %p3724_p12 = scmp.lt.u32.totalorder %s3717_s5, %s4902_s10 }
  0xf2   : > { %p3720_p2 = pnand %p3718_p0, %p4984_p10 }
  0xf4   : > { %p3721_p7 = pneg %p3720_p2 }
  0xf6   : > { %p3726_p13 = pnand %p3724_p12, %p3721_p7 }
  0xf8   : > { %3729 = shalt.err (!%p3726_p13)
}
  0xf9   : > { %s3730_s11 = scalar_lea.vmem %s586_s16, 2048  ;;  %p3738_p1 = scmp.lt.s32.totalorder %s586_s16, %s586_s16 }
  0xfa   : > { %p3731_p5 = scmp.ne.s32.totalorder %s586_s16, %s3730_s11  ;;  %p3739_p3 = scmp.lt.s32.totalorder %s3730_s11, %s3730_s11 }
  0xfc   : > { %p3733_p9 = pnand %p3731_p5, %p4984_p10  ;;  %p3740_p8 = por %p3739_p3, %p3738_p1 }
  0xfe   : > { %p3734_p11 = pneg %p3733_p9 }
 0x100   : > { %p3741_p4 = pnand %p3740_p8, %p3734_p11 }
 0x102   : > { %3744 = shalt.err (!%p3741_p4)
}
 0x103   : > { %3383 = dma.hbm_to_vmem [thread:$0]  (!%p4985_p6), %s4902_s10, 2048, %s586_s16, [#allocation18], %s4987_s28, %s4987_s28, %s4986_s13  }
 0x104   : > { %s4988_s2 = sld [smem:[#allocation38_spill]]  ;;  %s624_s3 = scalar_lea.vmem [#allocation2], %s4241_s25 }
 0x105   : > { %s631_s14 = sshll.u32 %s624_s3, 4  ;;  %s4989_s0 = sld [smem:[#allocation40_spill]]  ;;  %s4400_s14 = int_to_ptr.vmem [resolvable:$true] %s631_s14 }
 0x106   : > { %s4991_s11 = sand.u32 1, %s3949_s20   ;;  %p4992_p6 = scmp.ne.s32.totalorder %s4981_s29, 0 }
 0x107   : > { %s621_s13 = scalar_lea.sflag [#allocation3], %s4991_s11 }
 0x10a   : > { %s4397_s26 = scalar_lea.hbm %s4988_s2, %s4244_s22  ;;  %s3750_s18 = scalar_lea.hbm %s4988_s2, 256 }
 0x10b   : > { %s4990_s17 = smov %s4989_s0  ;;  %s4406_s15 = scalar_lea.hbm %s4989_s0, %s4244_s22 }
 0x10c   : > { %s3745_s28 = scalar_lea.hbm %s4397_s26, 128  ;;  %p3751_p7 = scmp.lt.u32.totalorder %s4397_s26, %s4988_s2 }
 0x10d   : > { %p3746_p10 = scmp.ne.s32.totalorder %s4397_s26, %s3745_s28  ;;  %p3752_p12 = scmp.lt.u32.totalorder %s3750_s18, %s3745_s28 }
 0x10e   : > { %p3754_p5 = scmp.lt.u32.totalorder %s3745_s28, %s4397_s26 }
 0x10f   : > { %p3748_p0 = pnand %p3746_p10, %p4992_p6  ;;  %p3753_p13 = por %p3752_p12, %p3751_p7 }
 0x111   : > { %p3749_p2 = pneg %p3748_p0  ;;  %p3755_p9 = por %p3754_p5, %p3753_p13 }
 0x113   : > { %p3756_p11 = pnand %p3755_p9, %p3749_p2 }
 0x115   : > { %3759 = shalt.err (!%p3756_p11)
}
 0x116   : > { %s3760_s3 = scalar_lea.vmem %s4400_s14, 128  ;;  %s3965_s5 = smov [#allocation2]  }
 0x117   : > { %p3761_p1 = scmp.ne.s32.totalorder %s4400_s14, %s3760_s3  ;;  %s3765_s9 = sshll.u32 %s3965_s5, 4  ;;  %s3766_s9 = int_to_ptr.vmem [resolvable:$false] %s3765_s9 }
 0x118   : > { %s3767_s0 = scalar_lea.vmem %s3766_s9, 256  ;;  %p3768_p4 = scmp.lt.s32.totalorder %s4400_s14, %s3766_s9 }
 0x119   : > { %p3763_p3 = pnand %p3761_p1, %p4992_p6  ;;  %p3769_p10 = scmp.lt.s32.totalorder %s3767_s0, %s3760_s3 }
 0x11b   : > { %p3764_p8 = pneg %p3763_p3  ;;  %p3770_p0 = por %p3769_p10, %p3768_p4 }
 0x11d   : > { %p3771_p7 = pnand %p3770_p0, %p3764_p8 }
 0x11f   : > { %3774 = shalt.err (!%p3771_p7)
}
 0x120   : > { %p4993_p2 = scmp.ne.s32.totalorder %s4979_s12, 0  ;;  %s660_s11 = scalar_lea.vmem [#allocation7], %s4241_s25 }
 0x121   : > { %s667_s28 = sshll.u32 %s660_s11, 4  ;;  %s4436_s18 = scalar_lea.hbm %s4896_s4, %s4244_s22  ;;  %s668_s28 = int_to_ptr.vmem [resolvable:$true] %s667_s28 }
 0x122   : > { %3387 = dma.hbm_to_vmem [thread:$0]  (!%p4993_p2), %s4397_s26, 128, %s4400_s14, %s621_s13  }
 0x123   : > { %s3775_s24 = scalar_lea.hbm %s4406_s15, 128  ;;  %s3780_s5 = scalar_lea.hbm %s4990_s17, 256 }
 0x124   : > { %p3776_p12 = scmp.ne.s32.totalorder %s4406_s15, %s3775_s24  ;;  %p3781_p9 = scmp.lt.u32.totalorder %s4406_s15, %s4990_s17 }
 0x125   : > { %p3782_p11 = scmp.lt.u32.totalorder %s3780_s5, %s3775_s24  ;;  %p3784_p3 = scmp.lt.u32.totalorder %s3775_s24, %s4406_s15 }
 0x126   : > { %p3778_p13 = pnand %p3776_p12, %p4992_p6 }
 0x127   : > { %p3783_p1 = por %p3782_p11, %p3781_p9 }
 0x128   : > { %p3779_p5 = pneg %p3778_p13 }
 0x129   : > { %p3785_p8 = por %p3784_p3, %p3783_p1 }
 0x12b   : > { %p3786_p4 = pnand %p3785_p8, %p3779_p5 }
 0x12d   : > { %3789 = shalt.err (!%p3786_p4)
}
 0x12e   : > { %s3790_s22 = scalar_lea.vmem %s668_s28, 128  ;;  %s3966_s26 = smov [#allocation7]  }
 0x12f   : > { %p3791_p10 = scmp.ne.s32.totalorder %s668_s28, %s3790_s22  ;;  %s3795_s14 = sshll.u32 %s3966_s26, 4  ;;  %s3796_s14 = int_to_ptr.vmem [resolvable:$false] %s3795_s14 }
 0x130   : > { %s3797_s13 = scalar_lea.vmem %s3796_s14, 256  ;;  %p3798_p12 = scmp.lt.s32.totalorder %s668_s28, %s3796_s14 }
 0x131   : > { %p3793_p0 = pnand %p3791_p10, %p4992_p6  ;;  %p3799_p13 = scmp.lt.s32.totalorder %s3797_s13, %s3790_s22 }
 0x133   : > { %p3794_p7 = pneg %p3793_p0  ;;  %p3800_p2 = por %p3799_p13, %p3798_p12 }
 0x135   : > { %p3801_p9 = pnand %p3800_p2, %p3794_p7 }
 0x137   : > { %3804 = shalt.err (!%p3801_p9)
}
 0x138   : > { %p4994_p11 = scmp.ne.s32.totalorder %s4979_s12, 0  ;;  %s696_s11 = scalar_lea.vmem [#allocation10], %s4241_s25 }
 0x139   : > { %s703_s16 = sshll.u32 %s696_s11, 4  ;;  %s3805_s19 = scalar_lea.hbm %s4436_s18, 128  ;;  %s704_s16 = int_to_ptr.vmem [resolvable:$true] %s703_s16 }
 0x13a   : > { %3393 = dma.hbm_to_vmem [thread:$0]  (!%p4994_p11), %s4406_s15, 128, %s668_s28, %s4262_s7  }
 0x13b   : > { %p3806_p5 = scmp.ne.s32.totalorder %s4436_s18, %s3805_s19  ;;  %s3810_s3 = scalar_lea.hbm %s4896_s4, 256 }
 0x13c   : > { %p3811_p3 = scmp.lt.u32.totalorder %s4436_s18, %s4896_s4  ;;  %p3812_p8 = scmp.lt.u32.totalorder %s3810_s3, %s3805_s19 }
 0x13d   : > { %p3808_p1 = pnand %p3806_p5, %p4992_p6  ;;  %p3814_p10 = scmp.lt.u32.totalorder %s3805_s19, %s4436_s18 }
 0x13e   : > { %p3813_p4 = por %p3812_p8, %p3811_p3 }
 0x13f   : > { %p3809_p2 = pneg %p3808_p1 }
 0x140   : > { %p3815_p0 = por %p3814_p10, %p3813_p4 }
 0x142   : > { %p3816_p7 = pnand %p3815_p0, %p3809_p2 }
 0x144   : > { %3819 = shalt.err (!%p3816_p7)
}
 0x145   : > { %s3820_s7 = scalar_lea.vmem %s704_s16, 128  ;;  %s3967_s25 = smov [#allocation10]  }
 0x146   : > { %p3821_p12 = scmp.ne.s32.totalorder %s704_s16, %s3820_s7  ;;  %s3825_s15 = sshll.u32 %s3967_s25, 4  ;;  %s3826_s15 = int_to_ptr.vmem [resolvable:$false] %s3825_s15 }
 0x147   : > { %s3827_s28 = scalar_lea.vmem %s3826_s15, 256  ;;  %p3828_p5 = scmp.lt.s32.totalorder %s704_s16, %s3826_s15 }
 0x148   : > { %p3823_p13 = pnand %p3821_p12, %p4992_p6  ;;  %p3829_p1 = scmp.lt.s32.totalorder %s3827_s28, %s3820_s7 }
 0x14a   : > { %p3824_p9 = pneg %p3823_p13  ;;  %p3830_p11 = por %p3829_p1, %p3828_p5 }
 0x14c   : > { %p3831_p3 = pnand %p3830_p11, %p3824_p9 }
 0x14e   : > { %3834 = shalt.err (!%p3831_p3)
}
 0x14f   : > { %p4995_p8 = scmp.ne.s32.totalorder %s4979_s12, 0  ;;  %p4996_p2 = scmp.ne.s32.totalorder %s4966_s23, 0 }
 0x150   : > { %s4478_s29 = sand.u32 (!%p4996_p2), 1, %s3945_s30   ;;  %p4997_p6 = scmp.ne.s32.totalorder (!%p4996_p2), %s4974_s27, 0 }
 0x151   : > { %3399 = dma.hbm_to_vmem [thread:$0]  (!%p4995_p8), %s4436_s18, 128, %s704_s16, %s4305_s1  }
 0x152   : > { %712 = sbr.rel (%p4996_p2) target bundleno = 2915 (0xb63), region = 92  ;;  %s4481_s0 = sshll.u32 (!%p4996_p2), %s4478_s29, 3 }
 0x153   : > { %s715_s22 = scalar_lea.sflag (!%p4996_p2), [#allocation3], %s4478_s29  ;;  %s718_s26 = scalar_lea.vmem (!%p4996_p2), [#allocation2], %s4481_s0 }
 0x159   : > { %3908 = dma.done.wait (%p4997_p6), %s715_s22, 128  }
 0x15a   : > { %3910 = vsyncadd (%p4997_p6), %s715_s22, 4294967168  ;;  %s4998_s1 = sld [smem:[#allocation33_spill]]  ;;  %s727_s18 = scalar_lea.vmem [#allocation5], %s4481_s0 }
 0x160   : > { %s723_s23 = sand.u32 1, %s4998_s1  }
 0x161   : > { %s724_s12 = scalar_lea.sflag [#allocation6], %s723_s23 }
 0x162   : > { %3912 = dma.done.wait (%p4997_p6), %s724_s12, 256  }
 0x163   : > { %3914 = vsyncadd (%p4997_p6), %s724_s12, 4294967040  ;;  %s736_s14 = scalar_lea.vmem [#allocation7], %s4481_s0  ;;  %s742_s13 = scalar_lea.sflag [#allocation9], %s723_s23 }
 0x164   : > { %s745_s11 = scalar_lea.vmem [#allocation8], %s4481_s0 }
 0x165   : > { %3916 = dma.done.wait (%p4997_p6), %s742_s13, 256  }
 0x166   : > { %3918 = vsyncadd (%p4997_p6), %s742_s13, 4294967040  ;;  %s754_s16 = scalar_lea.vmem [#allocation10], %s4481_s0  ;;  %p4999_p11 = scmp.eq.s32.totalorder %s4998_s1, 0 }
 0x168   : > { %3920 = dma.done.wait (%p4999_p11), [#allocation12], 4096   ;;  %p5000_p4 = pmov %p4999_p11 }
 0x16a   : > { %3922 = vsyncadd (%p5000_p4), [#allocation12], 4294963200  ;;  %p5001_p10 = pmov %p5000_p4 }
 0x16b   : > { %p5002_p0 = pmov %p5000_p4 }
 0x16c   : > { %3924 = dma.done.wait (%p5001_p10), [#allocation15], 4096  }
 0x16d   : > { %3926 = vsyncadd (%p5002_p0), [#allocation15], 4294963200  ;;  %p5003_p7 = pmov %p5002_p0 }
 0x16e   : > { %p5004_p12 = pmov %p5002_p0 }
 0x16f   : > { %3928 = dma.done.wait (%p5003_p7), [#allocation18], 4096  }
 0x170   : > { %3930 = vsyncadd (%p5004_p12), [#allocation18], 4294963200  ;;  %v3968_v0 = vmov 0.0|0.0   ;;  %vm3969_vm0 = vmmov 0   ;;  %v3970_v1 = vmov 0.0   ;;  %v956_v2 = vld [vmem:[#allocation13] sm:$0xff] }
 0x171   : > { %3207 = vmatprep.subr.bf16.mxu1 %v3968_v0  ;;  %3183 = vmatprep.subr.bf16.mxu0 %v3968_v0  ;;  %v957_v3 = vld [vmem:[#allocation13 + $0x8] sm:$0xff]  ;;  %v958_v4 = vld [vmem:[#allocation13 + $0x10] sm:$0xff]  ;;  %v959_v6 = vld [vmem:[#allocation13 + $0x18] sm:$0xff]  ;;  %s5005_s24 = sld [smem:[#allocation48_spill]]  ;;  %vm1329_vm1 = vcmask 261120   ;;  %s5006_s5 = sld [smem:[#allocation45_spill]] }
 0x172   : > { %2976 = vmatprep.mubr.msk.f32.mxu1 %vm3969_vm0, %v3970_v1  ;;  %2941 = vmatprep.mubr.msk.f32.mxu0 %vm3969_vm0, %v3970_v1  ;;  %v3208_v5 = vpack.c.bf16 %v957_v3, %v956_v2  ;;  %v863_v7 = vld [vmem:[#allocation11] sm:$0xff]  ;;  %v864_v8 = vld [vmem:[#allocation11 + $0x8] sm:$0xff]  ;;  %v3211_v9 = vpack.c.bf16 %v959_v6, %v958_v4  ;;  %v865_v11 = vld [vmem:[#allocation11 + $0x10] sm:$0xff]  ;;  %s5007_s25 = sld [smem:[#allocation46_spill]]  ;;  %s5008_s22 = sld [smem:[#allocation47_spill]]  ;;  %vm1425_vm2 = vcmask 64512  }
 0x173   : > { %v3184_v10 = vpack.c.bf16 %v864_v8, %v863_v7  ;;  %v866_v12 = vld [vmem:[#allocation11 + $0x18] sm:$0xff]  ;;  %v960_v13 = vld [vmem:[#allocation13 + $0x20] sm:$0xff]  ;;  %v961_v14 = vld [vmem:[#allocation13 + $0x28] sm:$0xff]  ;;  %s5009_s12 = sld [smem:[#allocation49_spill]]  ;;  %s5010_s13 = sld [smem:[#allocation51_spill]]  ;;  %vm2334_vm3 = vcmask 523264  }
 0x174   : > { %3209 = vmatpush3.bf16.msra.mxu1 %v3208_v5  ;;  %v3187_v15 = vpack.c.bf16 %v866_v12, %v865_v11  ;;  %v867_v16 = vld [vmem:[#allocation11 + $0x20] sm:$0xff]  ;;  %v868_v17 = vld [vmem:[#allocation11 + $0x28] sm:$0xff]  ;;  %v3214_v18 = vpack.c.bf16 %v961_v14, %v960_v13  ;;  %v962_v19 = vld [vmem:[#allocation13 + $0x30] sm:$0xff]  ;;  %s2748_s27 = sshll.u32 %s4478_s29, 5  ;;  %s5011_s21 = sld [smem:[#allocation36_spill]]  ;;  %vm2336_vm4 = vcmask 785408  }
 0x175   : > { %3210 = vmatprep.subr.bf16.mxu1 %v3968_v0  ;;  %3185 = vmatpush3.bf16.msra.mxu0 %v3184_v10  ;;  %v963_v20 = vld [vmem:[#allocation13 + $0x38] sm:$0xff]  ;;  %v3190_v21 = vpack.c.bf16 %v868_v17, %v867_v16  ;;  %v869_v22 = vld [vmem:[#allocation11 + $0x30] sm:$0xff]  ;;  %v964_v25 = vld [vmem:[#allocation13 + $0x40] sm:$0xff]  ;;  %s4667_s19 = scalar_lea.vmem [#allocation21], %s2748_s27  ;;  %s2782_s3 = sshll.u32 %s4998_s1, 9 }
 0x176   : > { %3186 = vmatprep.subr.bf16.mxu0 %v3968_v0  ;;  %v870_v23 = vld [vmem:[#allocation11 + $0x38] sm:$0xff]  ;;  %v3217_v24 = vpack.c.bf16 %v963_v20, %v962_v19  ;;  %v965_v26 = vld [vmem:[#allocation13 + $0x48] sm:$0xff]  ;;  %v871_v28 = vld [vmem:[#allocation11 + $0x40] sm:$0xff]  ;;  %s2442_s28 = scalar_lea.sflag [#allocation22], %s4478_s29 }
 0x177   : > { %v3193_v27 = vpack.c.bf16 %v870_v23, %v869_v22  ;;  %v872_v29 = vld [vmem:[#allocation11 + $0x48] sm:$0xff]  ;;  %v3220_v30 = vpack.c.bf16 %v965_v26, %v964_v25  ;;  %v966_v31 = vld [vmem:[#allocation13 + $0x50] sm:$0xff]  ;;  %v967_v32 = vld [vmem:[#allocation13 + $0x58] sm:$0xff] }
 0x178   : > { %3212 = vmatpush3.bf16.msra.mxu1 %v3211_v9  ;;  %v3196_v33 = vpack.c.bf16 %v872_v29, %v871_v28  ;;  %v873_v34 = vld [vmem:[#allocation11 + $0x50] sm:$0xff]  ;;  %v874_v35 = vld [vmem:[#allocation11 + $0x58] sm:$0xff]  ;;  %v3223_v36 = vpack.c.bf16 %v967_v32, %v966_v31  ;;  %v968_v37 = vld [vmem:[#allocation13 + $0x60] sm:$0xff] }
 0x179   : > { %3213 = vmatprep.subr.bf16.mxu1 %v3968_v0  ;;  %3188 = vmatpush3.bf16.msra.mxu0 %v3187_v15  ;;  %v969_v38 = vld [vmem:[#allocation13 + $0x68] sm:$0xff]  ;;  %v3199_v39 = vpack.c.bf16 %v874_v35, %v873_v34  ;;  %v875_v40 = vld [vmem:[#allocation11 + $0x60] sm:$0xff]  ;;  %v970_v43 = vld [vmem:[#allocation13 + $0x70] sm:$0xff] }
 0x17a   : > { %3189 = vmatprep.subr.bf16.mxu0 %v3968_v0  ;;  %v876_v41 = vld [vmem:[#allocation11 + $0x68] sm:$0xff]  ;;  %v3226_v42 = vpack.c.bf16 %v969_v38, %v968_v37  ;;  %v971_v44 = vld [vmem:[#allocation13 + $0x78] sm:$0xff]  ;;  %v877_v46 = vld [vmem:[#allocation11 + $0x70] sm:$0xff]  ;;  %p5013_p9 = scmp.ne.s32.totalorder %s5011_s21, 0 }
 0x17b   : > { %v3202_v45 = vpack.c.bf16 %v876_v41, %v875_v40  ;;  %v878_v47 = vld [vmem:[#allocation11 + $0x78] sm:$0xff]  ;;  %v3229_v48 = vpack.c.bf16 %v971_v44, %v970_v43  ;;  %v1142_v49 = vld [vmem:[#allocation16] sm:$0xff]  ;;  %v1143_v50 = vld [vmem:[#allocation16 + $0x8] sm:$0xff] }
 0x17c   : > { %3215 = vmatpush3.bf16.msra.mxu1 %v3214_v18  ;;  %v3205_v51 = vpack.c.bf16 %v878_v47, %v877_v46  ;;  %v1049_v52 = vld [vmem:[#allocation14] sm:$0xff]  ;;  %v1050_v53 = vld [vmem:[#allocation14 + $0x8] sm:$0xff]  ;;  %v3256_v55 = vpack.c.bf16 %v1143_v50, %v1142_v49  ;;  %v1144_v56 = vld [vmem:[#allocation16 + $0x10] sm:$0xff] }
 0x17d   : > { %3216 = vmatprep.subr.bf16.mxu1 %v3968_v0  ;;  %3191 = vmatpush3.bf16.msra.mxu0 %v3190_v21  ;;  %v859_v54 = vld [vmem:[%s727_s18] sm:$0xff]  ;;  %v1145_v57 = vld [vmem:[#allocation16 + $0x18] sm:$0xff]  ;;  %v3232_v59 = vpack.c.bf16 %v1050_v53, %v1049_v52  ;;  %v1051_v60 = vld [vmem:[#allocation14 + $0x10] sm:$0xff] }
 0x17e   : > { %3192 = vmatprep.subr.bf16.mxu0 %v3968_v0  ;;  %v858_v58 = vld [vmem:[%s718_s26] sm:$0xff]  ;;  %v3259_v62 = vpack.c.bf16 %v1145_v57, %v1144_v56  ;;  %v1146_v63 = vld [vmem:[#allocation16 + $0x20] sm:$0xff]  ;;  %v1147_v2 = vld [vmem:[#allocation16 + $0x28] sm:$0xff]  ;;  %s3974_s26 = smov [#allocation21]  }
 0x17f   : > { %v1052_v61 = vld [vmem:[#allocation14 + $0x18] sm:$0xff]  ;;  %v1053_v4 = vld [vmem:[#allocation14 + $0x20] sm:$0xff]  ;;  %v1054_v5 = vld [vmem:[#allocation14 + $0x28] sm:$0xff]  ;;  %v3262_v6 = vpack.c.bf16 %v1147_v2, %v1146_v63  ;;  %s3839_s23 = sshll.u32 %s3974_s26, 4  ;;  %s3840_s23 = int_to_ptr.vmem [resolvable:$false] %s3839_s23 }
 0x180   : > { %3218 = vmatpush3.bf16.msra.mxu1 %v3217_v24  ;;  %v3235_v3 = vpack.c.bf16 %v1052_v61, %v1051_v60  ;;  %v1148_v7 = vld [vmem:[#allocation16 + $0x30] sm:$0xff]  ;;  %v1149_v8 = vld [vmem:[#allocation16 + $0x38] sm:$0xff]  ;;  %v3238_v9 = vpack.c.bf16 %v1054_v5, %v1053_v4  ;;  %v1150_v13 = vld [vmem:[#allocation16 + $0x40] sm:$0xff] }
 0x181   : > { %3219 = vmatprep.subr.bf16.mxu1 %v3968_v0  ;;  %3194 = vmatpush3.bf16.msra.mxu0 %v3193_v27  ;;  %v1055_v10 = vld [vmem:[#allocation14 + $0x30] sm:$0xff]  ;;  %v1056_v11 = vld [vmem:[#allocation14 + $0x38] sm:$0xff]  ;;  %v3265_v12 = vpack.c.bf16 %v1149_v8, %v1148_v7  ;;  %v1151_v14 = vld [vmem:[#allocation16 + $0x48] sm:$0xff] }
 0x182   : > { %3195 = vmatprep.subr.bf16.mxu0 %v3968_v0  ;;  %v3241_v15 = vpack.c.bf16 %v1056_v11, %v1055_v10  ;;  %v1057_v16 = vld [vmem:[#allocation14 + $0x40] sm:$0xff]  ;;  %v1058_v17 = vld [vmem:[#allocation14 + $0x48] sm:$0xff]  ;;  %v3268_v18 = vpack.c.bf16 %v1151_v14, %v1150_v13  ;;  %v1152_v19 = vld [vmem:[#allocation16 + $0x50] sm:$0xff] }
 0x183   : > { %v1153_v20 = vld [vmem:[#allocation16 + $0x58] sm:$0xff]  ;;  %v3244_v21 = vpack.c.bf16 %v1058_v17, %v1057_v16  ;;  %v1059_v22 = vld [vmem:[#allocation14 + $0x50] sm:$0xff]  ;;  %v1154_v25 = vld [vmem:[#allocation16 + $0x60] sm:$0xff] }
 0x184   : > { %3221 = vmatpush3.bf16.msra.mxu1 %v3220_v30  ;;  %v1060_v23 = vld [vmem:[#allocation14 + $0x58] sm:$0xff]  ;;  %v3271_v24 = vpack.c.bf16 %v1153_v20, %v1152_v19  ;;  %v1155_v26 = vld [vmem:[#allocation16 + $0x68] sm:$0xff]  ;;  %v1061_v28 = vld [vmem:[#allocation14 + $0x60] sm:$0xff] }
 0x185   : > { %3222 = vmatprep.subr.bf16.mxu1 %v3968_v0  ;;  %3197 = vmatpush3.bf16.msra.mxu0 %v3196_v33  ;;  %v3247_v27 = vpack.c.bf16 %v1060_v23, %v1059_v22  ;;  %v1062_v29 = vld [vmem:[#allocation14 + $0x68] sm:$0xff]  ;;  %v3274_v30 = vpack.c.bf16 %v1155_v26, %v1154_v25  ;;  %v1156_v31 = vld [vmem:[#allocation16 + $0x70] sm:$0xff]  ;;  %v1157_v32 = vld [vmem:[#allocation16 + $0x78] sm:$0xff] }
 0x186   : > { %3198 = vmatprep.subr.bf16.mxu0 %v3968_v0  ;;  %v3250_v33 = vpack.c.bf16 %v1062_v29, %v1061_v28  ;;  %v1063_v34 = vld [vmem:[#allocation14 + $0x70] sm:$0xff]  ;;  %v1064_v35 = vld [vmem:[#allocation14 + $0x78] sm:$0xff]  ;;  %v1235_v38 = vld [vmem:[#allocation17] sm:$0xff] }
 0x187   : > { %v3253_v37 = vpack.c.bf16 %v1064_v35, %v1063_v34  ;;  %v861_v40 = vld [vmem:[%s745_s11] sm:$0xff]  ;;  %v860_v41 = vld [vmem:[%s736_s14] sm:$0xff]  ;;  %s3971_s11 = smov 96  }
 0x188   : > { %3224 = vmatpush3.bf16.msra.mxu1 %v3223_v36  ;;  %v3277_v36 = vpack.c.bf16 %v1157_v32, %v1156_v31  ;;  %v1237_v43 = vld [vmem:[#allocation17 + $0x10] sm:$0xff]  ;;  %v1238_v44 = vld [vmem:[#allocation17 + $0x18] sm:$0xff]  ;;  %v1239_v46 = vld [vmem:[#allocation17 + $0x20] sm:$0xff] }
 0x189   : > { %3225 = vmatprep.subr.bf16.mxu1 %v3968_v0  ;;  %3200 = vmatpush3.bf16.msra.mxu0 %v3199_v39  ;;  %v1236_v39 = vld [vmem:[#allocation17 + $0x8] sm:$0xff]  ;;  %v1241_v49 = vld [vmem:[#allocation17 + $0x30] sm:$0xff]  ;;  %v1242_v50 = vld [vmem:[#allocation17 + $0x38] sm:$0xff] }
 0x18a   : > { %3201 = vmatprep.subr.bf16.mxu0 %v3968_v0  ;;  %v1240_v47 = vld [vmem:[#allocation17 + $0x28] sm:$0xff]  ;;  %v1243_v52 = vld [vmem:[#allocation17 + $0x40] sm:$0xff]  ;;  %v1246_v56 = vld [vmem:[#allocation17 + $0x58] sm:$0xff] }
 0x18b   : > { %v1244_v53 = vld [vmem:[#allocation17 + $0x48] sm:$0xff]  ;;  %v1249_v61 = vld [vmem:[#allocation17 + $0x70] sm:$0xff] }
 0x18c   : > { %3227 = vmatpush3.bf16.msra.mxu1 %v3226_v42  ;;  %v3280_v42 = vpack.c.bf16 %v1236_v39, %v1235_v38  ;;  %v862_v2 = vld [vmem:[%s754_s16] sm:$0xff]  ;;  %s3972_s16 = smov 64  }
 0x18d   : > { %3228 = vmatprep.subr.bf16.mxu1 %v3968_v0  ;;  %3203 = vmatpush3.bf16.msra.mxu0 %v3202_v45  ;;  %v3283_v45 = vpack.c.bf16 %v1238_v44, %v1237_v43  ;;  %v2752_v7 = vld [vmem:[%s5005_s24] ss:$0 sm:$0xff]  ;;  %s3973_s24 = smov 32  }
 0x18e   : > { %3204 = vmatprep.subr.bf16.mxu0 %v3968_v0  ;;  %v2751_v16 = vld [vmem:[%s5008_s22] ss:$0 sm:$0xff] }
 0x18f   : > { %v2753_v19 = vld [vmem:[%s5009_s12] ss:$0 sm:$0xff]  ;;  %s3841_s12 = scalar_lea.vmem %s3840_s23, 1024 }
 0x190   : > { %3230 = vmatpush3.bf16.msra.mxu1 %v3229_v48  ;;  %v3286_v48 = vpack.c.bf16 %v1240_v47, %v1239_v46  ;;  %v4625_v23 = vld [vmem:[%s5010_s13] sm:$0xff] }
 0x191   : > { %3255 = vmatprep.subr.bf16.mxu1 %v3968_v0  ;;  %3206 = vmatpush3.bf16.msra.mxu0 %v3205_v51  ;;  %v3289_v51 = vpack.c.bf16 %v1242_v50, %v1241_v49 }
 0x192   : > { %3231 = vmatprep.subr.bf16.mxu0 %v3968_v0 }
 0x193   : > { %2977 = vmatmul.mubr.f32.vlgmr.msra.gmra.mrb[0].mxu1 %v859_v54  ;;  %v3292_v54 = vpack.c.bf16 %v1244_v53, %v1243_v52 }
 0x194   : > { %3257 = vmatpush3.bf16.msra.mxu1 %v3256_v55  ;;  %3046 = vmatprep.mubr.msk.f32.mxu1 %vm3969_vm0, %v3970_v1  ;;  %v1245_v55 = vld [vmem:[#allocation17 + $0x50] sm:$0xff] }
 0x195   : > { %3258 = vmatprep.subr.bf16.mxu1 %v3968_v0  ;;  %2942 = vmatmul.mubr.f32.vlgmr.msra.gmra.mrb[0].mxu0 %v858_v58  ;;  %v3295_v57 = vpack.c.bf16 %v1246_v56, %v1245_v55  ;;  %v1247_v58 = vld [vmem:[#allocation17 + $0x60] sm:$0xff] }
 0x196   : > { %3233 = vmatpush3.bf16.msra.mxu0 %v3232_v59  ;;  %3011 = vmatprep.mubr.msk.f32.mxu0 %vm3969_vm0, %v3970_v1  ;;  %v1248_v59 = vld [vmem:[#allocation17 + $0x68] sm:$0xff] }
 0x197   : > { %3234 = vmatprep.subr.bf16.mxu0 %v3968_v0  ;;  %v3298_v60 = vpack.c.bf16 %v1248_v59, %v1247_v58 }
 0x198   : > { %3260 = vmatpush3.bf16.msra.mxu1 %v3259_v62  ;;  %v1250_v62 = vld [vmem:[#allocation17 + $0x78] sm:$0xff] }
 0x199   : > { %3261 = vmatprep.subr.bf16.mxu1 %v3968_v0  ;;  %v3301_v63 = vpack.c.bf16 %v1250_v62, %v1249_v61 }
 0x19a   : > { %3236 = vmatpush3.bf16.msra.mxu0 %v3235_v3 }
 0x19b   : > { %3237 = vmatprep.subr.bf16.mxu0 %v3968_v0 }
 0x19c   : > { %3263 = vmatpush3.bf16.msra.mxu1 %v3262_v6 }
 0x19d   : > { %3264 = vmatprep.subr.bf16.mxu1 %v3968_v0 }
 0x19e   : > { %3239 = vmatpush3.bf16.msra.mxu0 %v3238_v9  ;;  %v2749_v9 = vld [vmem:[%s5006_s5] ss:$0 sm:$0xff]  ;;  %s2468_s5 = sshll.u32 %s4667_s19, 4  ;;  %s4814_s5 = int_to_ptr.vmem [resolvable:$true] %s2468_s5 }
 0x19f   : > { %3240 = vmatprep.subr.bf16.mxu0 %v3968_v0  ;;  %s3835_s22 = scalar_lea.vmem %s4814_s5, 512  ;;  %p3842_p3 = scmp.lt.s32.totalorder %s4814_s5, %s3840_s23 }
 0x1a0   : > { %3266 = vmatpush3.bf16.msra.mxu1 %v3265_v12  ;;  %p3836_p13 = scmp.ne.s32.totalorder %s4814_s5, %s3835_s22  ;;  %p3843_p8 = scmp.lt.s32.totalorder %s3841_s12, %s3835_s22 }
 0x1a1   : > { %3267 = vmatprep.subr.bf16.mxu1 %v3968_v0 }
 0x1a2   : > { %3242 = vmatpush3.bf16.msra.mxu0 %v3241_v15  ;;  %v2750_v15 = vld [vmem:[%s5007_s25] ss:$0 sm:$0xff]  ;;  %s5012_s25 = sld [smem:[#allocation53_spill]]  ;;  %p3837_p5 = pnand %p3836_p13, %p5013_p9 }
 0x1a3   : > { %3243 = vmatprep.subr.bf16.mxu0 %v3968_v0  ;;  %p3844_p2 = por %p3843_p8, %p3842_p3 }
 0x1a4   : > { %3269 = vmatpush3.bf16.msra.mxu1 %v3268_v18  ;;  %p3838_p1 = pneg %p3837_p5 }
 0x1a5   : > { %3270 = vmatprep.subr.bf16.mxu1 %v3968_v0 }
 0x1a6   : > { %3245 = vmatpush3.bf16.msra.mxu0 %v3244_v21  ;;  %p3845_p6 = pnand %p3844_p2, %p3838_p1 }
 0x1a7   : > { %3246 = vmatprep.subr.bf16.mxu0 %v3968_v0 }
 0x1a8   : > { %3272 = vmatpush3.bf16.msra.mxu1 %v3271_v24  ;;  %s4812_s15 = scalar_lea.hbm %s5012_s25, %s2782_s3 }
 0x1a9   : > { %3273 = vmatprep.subr.bf16.mxu1 %v3968_v0 }
 0x1aa   : > { %3248 = vmatpush3.bf16.msra.mxu0 %v3247_v27 }
 0x1ab   : > { %3249 = vmatprep.subr.bf16.mxu0 %v3968_v0 }
 0x1ac   : > { %3275 = vmatpush3.bf16.msra.mxu1 %v3274_v30 }
 0x1ad   : > { %3276 = vmatprep.subr.bf16.mxu1 %v3968_v0 }
 0x1ae   : > { %3251 = vmatpush3.bf16.msra.mxu0 %v3250_v33 }
 0x1af   : > { %3252 = vmatprep.subr.bf16.mxu0 %v3968_v0 }
 0x1b0   : > { %3278 = vmatpush3.bf16.msra.mxu1 %v3277_v36 }
 0x1b1   : > { %3095 = vmatprep.subr.mxu1 %v3970_v1 }
 0x1b2   : > { %3254 = vmatpush3.bf16.msra.mxu0 %v3253_v37 }
 0x1b3   : > { %3047 = vmatmul.mubr.f32.vlgmr.msra.gmra.mrb[2].mxu1 %v861_v40  ;;  %3279 = vmatprep.subr.bf16.mxu0 %v3968_v0 }
 0x1b4   : > { %3097 = vmatprep.mubr.msk.f32.mxu1 %vm3969_vm0, %v3970_v1 }
 0x1b5   : > { %3012 = vmatmul.mubr.f32.vlgmr.msra.gmra.mrb[2].mxu0 %v860_v41 }
 0x1b6   : > { %3281 = vmatpush3.bf16.msra.mxu0 %v3280_v42  ;;  %3081 = vmatprep.mubr.msk.f32.mxu0 %vm3969_vm0, %v3970_v1 }
 0x1b7   : > { %3282 = vmatprep.subr.bf16.mxu0 %v3968_v0 }
 0x1ba   : > { %3284 = vmatpush3.bf16.msra.mxu0 %v3283_v45 }
 0x1bb   : > { %3285 = vmatprep.subr.bf16.mxu0 %v3968_v0 }
 0x1be   : > { %3287 = vmatpush3.bf16.msra.mxu0 %v3286_v48 }
 0x1bf   : > { %3288 = vmatprep.subr.bf16.mxu0 %v3968_v0 }
 0x1c2   : > { %3290 = vmatpush3.bf16.msra.mxu0 %v3289_v51 }
 0x1c3   : > { %3291 = vmatprep.subr.bf16.mxu0 %v3968_v0 }
 0x1c6   : > { %3293 = vmatpush3.bf16.msra.mxu0 %v3292_v54 }
 0x1c7   : > { %3294 = vmatprep.subr.bf16.mxu0 %v3968_v0 }
 0x1ca   : > { %3296 = vmatpush3.bf16.msra.mxu0 %v3295_v57 }
 0x1cb   : > { %3297 = vmatprep.subr.bf16.mxu0 %v3968_v0 }
 0x1ce   : > { %3299 = vmatpush3.bf16.msra.mxu0 %v3298_v60 }
 0x1cf   : > { %3300 = vmatprep.subr.bf16.mxu0 %v3968_v0 }
 0x1d2   : > { %3302 = vmatpush3.bf16.msra.mxu0 %v3301_v63 }
 0x1d3   : > { %3084 = vmatprep.subr.mxu0 %v3970_v1 }
 0x1d5   : > { %3082 = vmatmul.mubr.f32.vlgmr.msra.gmra.mrb[4].mxu0 %v862_v2 }
 0x1d6   : > { %3086 = vmatprep.mubr.msk.f32.mxu0 %vm3969_vm0, %v3970_v1 }
 0x266   : > { %v1045_v3 = vpop.f32.mrb[0].mxu1 }
 0x267   : > { %v2978_v4 = vpop.f32.mrb[1].mxu1  ;;  %v4603_v17 = vadd.f32 %v2750_v15, %v1045_v3 }
 0x268   : > { %v952_v5 = vpop.f32.mrb[0].mxu0 }
 0x269   : > { %v2943_v6 = vpop.f32.mrb[1].mxu0  ;;  %v4590_v14 = vadd.f32 %v2749_v9, %v952_v5 }
 0x286   : > { %v1231_v8 = vpop.f32.mrb[2].mxu1 }
 0x287   : > { %v4586_v10 = vadd.f32 %v2752_v7, %v1231_v8  ;;  %v3048_v11 = vpop.f32.mrb[3].mxu1 }
 0x288   : > { %v1138_v12 = vpop.f32.mrb[2].mxu0 }
 0x289   : > { %3085 = vmatpush3.xpose.msk.msra.mxu0 %vm1329_vm1, %v4586_v10  ;;  %v3013_v13 = vpop.f32.mrb[3].mxu0  ;;  %v4605_v18 = vadd.f32 %v2751_v16, %v1138_v12 }
 0x28a   : > { %3116 = vmatprep.subr.mxu0 %v3970_v1 }
 0x28c   : > { %3087 = vmatmul.mubr.msk.f32.vlgmr.msra.gmra.mrb[6].mxu0 %vm1329_vm1, %v4590_v14 }
 0x28d   : > { %3089 = vmatprep.mubr.msk.f32.mxu0 %vm3969_vm0, %v3970_v1 }
 0x290   : > { %3090 = vmatmul.mubr.msk.f32.gmra.mrb[8].mxu0 %vm1329_vm1, %v4603_v17 }
 0x291   : > { %3092 = vmatprep.mubr.msk.f32.mxu0 %vm3969_vm0, %v3970_v1 }
 0x294   : > { %3093 = vmatmul.mubr.msk.f32.gmra.mrb[10].mxu0 %vm1329_vm1, %v4605_v18 }
 0x295   : > { %3118 = vmatprep.mubr.msk.f32.mxu0 %vm3969_vm0, %v3970_v1 }
 0x2a8   : > { %v1324_v20 = vpop.f32.mrb[4].mxu0 }
 0x2a9   : > { %v4618_v21 = vadd.f32 %v2753_v19, %v1324_v20  ;;  %v3083_v22 = vpop.f32.mrb[5].mxu0 }
 0x2ab   : > { %3096 = vmatpush3.msra.mxu1 %v4618_v21 }
 0x2ac   : > { %3100 = vmatprep.subr.mxu1 %v3970_v1 }
 0x35f   : > { %v1408_v24 = vpop.f32.mrb[6].mxu0 }
 0x360   : > { %v1422_v25 = vadd.f32 %v1408_v24, %v4625_v23  ;;  %v3088_v26 = vpop.f32.mrb[7].mxu0 }
 0x362   : > { %v1426_v27 = vsel %vm1425_vm2, %v1422_v25, -inf }
 0x363   : > { %1427 = vmax.xlane.f32.xlu0 %v1426_v27  ;;  %v1413_v28 = vpop.f32.mrb[8].mxu0 }
 0x364   : > { %v1423_v29 = vadd.f32 %v1413_v28, %v4625_v23  ;;  %v3091_v30 = vpop.f32.mrb[9].mxu0 }
 0x366   : > { %v1450_v31 = vsel %vm1425_vm2, %v1423_v29, -inf }
 0x367   : > { %1451 = vmax.xlane.f32.xlu0 %v1450_v31  ;;  %v1418_v32 = vpop.f32.mrb[10].mxu0 }
 0x368   : > { %v1424_v33 = vadd.f32 %v1418_v32, %v4625_v23  ;;  %v3094_v34 = vpop.f32.mrb[11].mxu0 }
 0x36a   : > { %v1475_v35 = vsel %vm1425_vm2, %v1424_v33, -inf }
 0x36b   : > { %1476 = vmax.xlane.f32.xlu1 %v1475_v35 }
 0x3f0   : > { %v1428_v36 = vpop.xlane.xlu0 %1427 }
 0x3f1   : > { %v1429_v37 = vrot.slane %v1428_v36, 4 }
 0x3f3   : > { %v1430_v38 = vmax.f32 %v1428_v36, %v1429_v37 }
 0x3f4   : > { %v1452_v39 = vpop.xlane.xlu0 %1451 }
 0x3f5   : > { %v1431_v40 = vrot.slane %v1430_v38, 2  ;;  %v1453_v41 = vrot.slane %v1452_v39, 4 }
 0x3f7   : > { %v1432_v42 = vmax.f32 %v1430_v38, %v1431_v40  ;;  %v1454_v43 = vmax.f32 %v1452_v39, %v1453_v41 }
 0x3f8   : > { %v1477_v44 = vpop.xlane.xlu1 %1476 }
 0x3f9   : > { %v1433_v45 = vrot.slane %v1432_v42, 1  ;;  %v1455_v46 = vrot.slane %v1454_v43, 2  ;;  %v1478_v47 = vrot.slane %v1477_v44, 4 }
 0x3fb   : > { %v1434_v48 = vmax.f32 %v1432_v42, %v1433_v45  ;;  %v1456_v49 = vmax.f32 %v1454_v43, %v1455_v46  ;;  %v1479_v50 = vmax.f32 %v1477_v44, %v1478_v47 }
 0x3fd   : > { %v1435_v51 = vsub.f32 %v1422_v25, %v1434_v48  ;;  %v1457_v52 = vrot.slane %v1456_v49, 1  ;;  %v1480_v53 = vrot.slane %v1479_v50, 2 }
 0x3ff   : > { %v1436_v54 = vmul.f32 1.442695, %v1435_v51  ;;  %v1458_v55 = vmax.f32 %v1456_v49, %v1457_v52  ;;  %v1481_v56 = vmax.f32 %v1479_v50, %v1480_v53 }
 0x401   : > { %3469 = vpow2.f32 %v1436_v54  ;;  %v1459_v57 = vsub.f32 %v1423_v29, %v1458_v55  ;;  %v1482_v58 = vrot.slane %v1481_v56, 1 }
 0x403   : > { %v1460_v59 = vmul.f32 1.442695, %v1459_v57  ;;  %v1483_v60 = vmax.f32 %v1481_v56, %v1482_v58 }
 0x405   : > { %3471 = vpow2.f32 %v1460_v59  ;;  %v1484_v61 = vsub.f32 %v1424_v33, %v1483_v60 }
 0x407   : > { %v1485_v62 = vmul.f32 1.442695, %v1484_v61 }
 0x409   : > { %3473 = vpow2.f32 %v1485_v62 }
 0x40b   : > { %v3470_v63 = vpop.eup %3469 }
 0x40c   : > { %v1438_v2 = vsel %vm1425_vm2, %v3470_v63, 0.0 }
 0x40d   : > { %1439 = vadd.xlane.f32.xlu1 %v1438_v2 }
 0x40f   : > { %v4634_v3 = vpop.eup %3471 }
 0x410   : > { %v1462_v4 = vsel %vm1425_vm2, %v4634_v3, 0.0 }
 0x411   : > { %1463 = vadd.xlane.f32.xlu0 %v1462_v4 }
 0x413   : > { %v4638_v5 = vpop.eup %3473 }
 0x414   : > { %v1487_v6 = vsel %vm1425_vm2, %v4638_v5, 0.0 }
 0x415   : > { %1488 = vadd.xlane.f32.xlu1 %v1487_v6 }
 0x426   : > { %1573 = vrot.lane.b32.xlu1 %v4590_v14, %s3971_s11 }
 0x427   : > { %1579 = vrot.lane.b32.xlu0 %v4586_v10, %s3971_s11 }
 0x42a   : > { %1829 = vrot.lane.b32.xlu1 %v4586_v10, %s3972_s16 }
 0x42b   : > { %1823 = vrot.lane.b32.xlu0 %v4590_v14, %s3972_s16 }
 0x42e   : > { %1575 = vrot.lane.b32.xlu1 %v4603_v17, %s3971_s11 }
 0x42f   : > { %1825 = vrot.lane.b32.xlu0 %v4603_v17, %s3972_s16 }
 0x432   : > { %1577 = vrot.lane.b32.xlu1 %v4605_v18, %s3971_s11 }
 0x436   : > { %1827 = vrot.lane.b32.xlu1 %v4605_v18, %s3972_s16 }
 0x49a   : > { %v1440_v7 = vpop.xlane.xlu1 %1439 }
 0x49b   : > { %v1441_v8 = vrot.slane %v1440_v7, 4 }
 0x49d   : > { %v1442_v9 = vadd.f32 %v1441_v8, %v1440_v7 }
 0x49e   : > { %v1464_v11 = vpop.xlane.xlu0 %1463 }
 0x49f   : > { %v1443_v12 = vrot.slane %v1442_v9, 2  ;;  %v1465_v13 = vrot.slane %v1464_v11, 4 }
 0x4a1   : > { %v1444_v15 = vadd.f32 %v1443_v12, %v1442_v9  ;;  %v1466_v16 = vadd.f32 %v1465_v13, %v1464_v11 }
 0x4a2   : > { %v1489_v19 = vpop.xlane.xlu1 %1488  ;;  %v1580_v27 = vpop.permute.xlu0 %1579 }
 0x4a3   : > { %v1445_v20 = vrot.slane %v1444_v15, 1  ;;  %v1467_v22 = vrot.slane %v1466_v16, 2  ;;  %v1490_v24 = vrot.slane %v1489_v19, 4 }
 0x4a5   : > { %v1446_v25 = vadd.f32 %v1445_v20, %v1444_v15  ;;  %v1468_v26 = vadd.f32 %v1467_v22, %v1466_v16  ;;  %v1491_v28 = vadd.f32 %v1490_v24, %v1489_v19 }
 0x4a6   : > { %v1574_v29 = vpop.permute.xlu1 %1573  ;;  %v1824_v36 = vpop.permute.xlu0 %1823 }
 0x4a7   : > { %3475 = vrcp.f32 %v1446_v25  ;;  %v1469_v30 = vrot.slane %v1468_v26, 1  ;;  %v1492_v31 = vrot.slane %v1491_v28, 2 }
 0x4a9   : > { %v1470_v32 = vadd.f32 %v1469_v30, %v1468_v26  ;;  %v1493_v33 = vadd.f32 %v1492_v31, %v1491_v28 }
 0x4aa   : > { %v1830_v34 = vpop.permute.xlu1 %1829  ;;  %v1826_v40 = vpop.permute.xlu0 %1825 }
 0x4ab   : > { %3477 = vrcp.f32 %v1470_v32  ;;  %v1494_v35 = vrot.slane %v1493_v33, 1  ;;  %3117 = vmatpush3.xpose.msk.msra.mxu0 %vm1329_vm1, %v1830_v34 }
 0x4ac   : > { %3143 = vmatprep.subr.mxu0 %v3970_v1 }
 0x4ad   : > { %v1495_v37 = vadd.f32 %v1494_v35, %v1493_v33 }
 0x4ae   : > { %3119 = vmatmul.mubr.msk.f32.vlgmr.msra.gmra.mrb[12].mxu0 %vm1329_vm1, %v1824_v36  ;;  %v1576_v38 = vpop.permute.xlu1 %1575 }
 0x4af   : > { %3479 = vrcp.f32 %v1495_v37  ;;  %3121 = vmatprep.mubr.msk.f32.mxu0 %vm3969_vm0, %v3970_v1 }
 0x4b1   : > { %v3476_v39 = vpop.eup %3475 }
 0x4b2   : > { %v1448_v41 = vmul.f32 8.0, %v3476_v39  ;;  %3122 = vmatmul.mubr.msk.f32.gmra.mrb[14].mxu0 %vm1329_vm1, %v1826_v40  ;;  %v1578_v42 = vpop.permute.xlu1 %1577 }
 0x4b3   : > { %3124 = vmatprep.mubr.msk.f32.mxu0 %vm3969_vm0, %v3970_v1 }
 0x4b4   : > { %v1449_v43 = vmul.f32 %v3470_v63, %v1448_v41 }
 0x4b5   : > { %v3478_v44 = vpop.eup %3477 }
 0x4b6   : > { %2432 = vst.msk [vmem:[%s4667_s19] sm:$0xff] %vm1425_vm2, %v1449_v43  ;;  %v1472_v45 = vmul.f32 8.0, %v3478_v44  ;;  %v1828_v46 = vpop.permute.xlu1 %1827 }
 0x4b7   : > { %3125 = vmatmul.mubr.msk.f32.gmra.mrb[16].mxu0 %vm1329_vm1, %v1828_v46 }
 0x4b8   : > { %v1473_v47 = vmul.f32 %v4634_v3, %v1472_v45  ;;  %3145 = vmatprep.mubr.msk.f32.mxu0 %vm3969_vm0, %v3970_v1 }
 0x4b9   : > { %v3480_v48 = vpop.eup %3479 }
 0x4ba   : > { %v1497_v49 = vmul.f32 8.0, %v3480_v48  ;;  %v1474_v50 = vadd.f32 %v1473_v47, %v1449_v43 }
 0x4bc   : > { %v1498_v51 = vmul.f32 %v4638_v5, %v1497_v49 }
 0x4be   : > { %v1499_v52 = vadd.f32 %v1498_v51, %v1474_v50 }
 0x4c0   : > { %3098 = vmatmul.mubr.msk.f32.vlgmr.msra.gmra.mrb[4].mxu1 %vm1425_vm2, %v1499_v52 }
 0x4c1   : > { %3101 = vmatpush3.xpose.msk.msra.mxu1 %vm1329_vm1, %v1580_v27  ;;  %3102 = vmatprep.mubr.msk.f32.mxu1 %vm3969_vm0, %v3970_v1 }
 0x4c2   : > { %3111 = vmatprep.subr.mxu1 %v3970_v1 }
 0x4c4   : > { %3103 = vmatmul.mubr.msk.f32.vlgmr.msra.gmra.mrb[6].mxu1 %vm1329_vm1, %v1574_v29 }
 0x4c5   : > { %3105 = vmatprep.mubr.msk.f32.mxu1 %vm3969_vm0, %v3970_v1 }
 0x4c8   : > { %3106 = vmatmul.mubr.msk.f32.gmra.mrb[8].mxu1 %vm1329_vm1, %v1576_v38 }
 0x4c9   : > { %3108 = vmatprep.mubr.msk.f32.mxu1 %vm3969_vm0, %v3970_v1 }
 0x4cc   : > { %3109 = vmatmul.mubr.msk.f32.gmra.mrb[10].mxu1 %vm1329_vm1, %v1578_v42 }
 0x4cd   : > { %3113 = vmatprep.mubr.msk.f32.mxu1 %vm3969_vm0, %v3970_v1 }
 0x581   : > { %v1905_v53 = vpop.f32.mrb[12].mxu0 }
 0x582   : > { %v3120_v54 = vpop.f32.mrb[13].mxu0  ;;  %v4694_v2 = vadd.f32 %v1905_v53, %v4625_v23 }
 0x584   : > { %v1922_v9 = vsel %vm1425_vm2, %v4694_v2, -inf }
 0x585   : > { %v1910_v55 = vpop.f32.mrb[14].mxu0 }
 0x586   : > { %v3123_v56 = vpop.f32.mrb[15].mxu0  ;;  %v4706_v15 = vadd.f32 %v1910_v55, %v4625_v23 }
 0x588   : > { %v1946_v20 = vsel %vm1425_vm2, %v4706_v15, -inf }
 0x58a   : > { %v1915_v57 = vpop.f32.mrb[16].mxu0 }
 0x58b   : > { %v3126_v58 = vpop.f32.mrb[17].mxu0  ;;  %v4699_v7 = vadd.f32 %v1915_v57, %v4625_v23 }
 0x58d   : > { %v1971_v19 = vsel %vm1425_vm2, %v4699_v7, -inf }
 0x593   : > { %v4690_v59 = vpop.f32.mrb[4].mxu1 }
 0x594   : > { %v3099_v60 = vpop.f32.mrb[5].mxu1 }
 0x597   : > { %v1655_v61 = vpop.f32.mrb[6].mxu1 }
 0x598   : > { %v1669_v62 = vadd.f32 %v1655_v61, %v4625_v23  ;;  %v3104_v63 = vpop.f32.mrb[7].mxu1 }
 0x59a   : > { %v1672_v3 = vsel %vm1425_vm2, %v1669_v62, -inf }
 0x59b   : > { %1673 = vmax.xlane.f32.xlu0 %v1672_v3  ;;  %v1660_v4 = vpop.f32.mrb[8].mxu1 }
 0x59c   : > { %v1670_v5 = vadd.f32 %v1660_v4, %v4625_v23  ;;  %v3107_v6 = vpop.f32.mrb[9].mxu1 }
 0x59e   : > { %v1696_v8 = vsel %vm1425_vm2, %v1670_v5, -inf }
 0x59f   : > { %1697 = vmax.xlane.f32.xlu1 %v1696_v8  ;;  %v1665_v11 = vpop.f32.mrb[10].mxu1  ;;  %1923 = vmax.xlane.f32.xlu0 %v1922_v9 }
 0x5a0   : > { %v1671_v12 = vadd.f32 %v1665_v11, %v4625_v23  ;;  %v3110_v13 = vpop.f32.mrb[11].mxu1 }
 0x5a2   : > { %v1721_v16 = vsel %vm1425_vm2, %v1671_v12, -inf }
 0x5a3   : > { %1722 = vmax.xlane.f32.xlu0 %v1721_v16  ;;  %1972 = vmax.xlane.f32.xlu1 %v1971_v19 }
 0x5a7   : > { %1947 = vmax.xlane.f32.xlu0 %v1946_v20 }
 0x628   : > { %v1674_v22 = vpop.xlane.xlu0 %1673 }
 0x629   : > { %v1675_v24 = vrot.slane %v1674_v22, 4 }
 0x62b   : > { %v1676_v25 = vmax.f32 %v1674_v22, %v1675_v24 }
 0x62c   : > { %v1698_v26 = vpop.xlane.xlu1 %1697  ;;  %v1924_v27 = vpop.xlane.xlu0 %1923 }
 0x62d   : > { %v1677_v28 = vrot.slane %v1676_v25, 2  ;;  %v1699_v29 = vrot.slane %v1698_v26, 4  ;;  %v1925_v30 = vrot.slane %v1924_v27, 4 }
 0x62f   : > { %v1678_v31 = vmax.f32 %v1676_v25, %v1677_v28  ;;  %v1700_v32 = vmax.f32 %v1698_v26, %v1699_v29  ;;  %v1926_v33 = vmax.f32 %v1924_v27, %v1925_v30 }
 0x630   : > { %v1723_v34 = vpop.xlane.xlu0 %1722  ;;  %v1973_v35 = vpop.xlane.xlu1 %1972 }
 0x631   : > { %v1679_v36 = vrot.slane %v1678_v31, 1  ;;  %v1701_v37 = vrot.slane %v1700_v32, 2  ;;  %v1927_v38 = vrot.slane %v1926_v33, 2  ;;  %v1724_v39 = vrot.slane %v1723_v34, 4 }
 0x632   : > { %v1974_v40 = vrot.slane %v1973_v35, 4 }
 0x633   : > { %v1680_v41 = vmax.f32 %v1678_v31, %v1679_v36  ;;  %v1702_v42 = vmax.f32 %v1700_v32, %v1701_v37  ;;  %v1928_v43 = vmax.f32 %v1926_v33, %v1927_v38  ;;  %v1725_v44 = vmax.f32 %v1723_v34, %v1724_v39 }
 0x634   : > { %v1975_v45 = vmax.f32 %v1973_v35, %v1974_v40  ;;  %v1948_v46 = vpop.xlane.xlu0 %1947 }
 0x635   : > { %v1681_v47 = vsub.f32 %v1669_v62, %v1680_v41  ;;  %v1703_v48 = vrot.slane %v1702_v42, 1  ;;  %v1929_v49 = vrot.slane %v1928_v43, 1  ;;  %v1726_v50 = vrot.slane %v1725_v44, 2 }
 0x636   : > { %v1976_v51 = vrot.slane %v1975_v45, 2  ;;  %v1949_v52 = vrot.slane %v1948_v46, 4 }
 0x637   : > { %v1682_v53 = vmul.f32 1.442695, %v1681_v47  ;;  %v1704_v54 = vmax.f32 %v1702_v42, %v1703_v48  ;;  %v1930_v55 = vmax.f32 %v1928_v43, %v1929_v49  ;;  %v1727_v56 = vmax.f32 %v1725_v44, %v1726_v50 }
 0x638   : > { %v1977_v57 = vmax.f32 %v1975_v45, %v1976_v51  ;;  %v1950_v58 = vmax.f32 %v1948_v46, %v1949_v52 }
 0x639   : > { %3481 = vpow2.f32 %v1682_v53  ;;  %v1705_v60 = vsub.f32 %v1670_v5, %v1704_v54  ;;  %v1931_v61 = vsub.f32 %v4694_v2, %v1930_v55  ;;  %v1728_v63 = vrot.slane %v1727_v56, 1 }
 0x63a   : > { %v1978_v3 = vrot.slane %v1977_v57, 1  ;;  %v1951_v4 = vrot.slane %v1950_v58, 2 }
 0x63b   : > { %v1706_v6 = vmul.f32 1.442695, %v1705_v60  ;;  %v1932_v62 = vmul.f32 1.442695, %v1931_v61  ;;  %v1729_v8 = vmax.f32 %v1727_v56, %v1728_v63 }
 0x63c   : > { %v1979_v9 = vmax.f32 %v1977_v57, %v1978_v3  ;;  %v1952_v11 = vmax.f32 %v1950_v58, %v1951_v4 }
 0x63d   : > { %3483 = vpow2.f32 %v1706_v6  ;;  %v1730_v13 = vsub.f32 %v1671_v12, %v1729_v8 }
 0x63e   : > { %v1980_v16 = vsub.f32 %v4699_v7, %v1979_v9  ;;  %v1953_v19 = vrot.slane %v1952_v11, 1  ;;  %3485 = vpow2.f32 %v1932_v62 }
 0x63f   : > { %v1731_v20 = vmul.f32 1.442695, %v1730_v13 }
 0x640   : > { %v1981_v22 = vmul.f32 1.442695, %v1980_v16  ;;  %v1954_v24 = vmax.f32 %v1952_v11, %v1953_v19 }
 0x641   : > { %3487 = vpow2.f32 %v1731_v20 }
 0x642   : > { %v1955_v2 = vsub.f32 %v4706_v15, %v1954_v24  ;;  %3489 = vpow2.f32 %v1981_v22 }
 0x643   : > { %v4716_v5 = vpop.eup %3481 }
 0x644   : > { %v1956_v25 = vmul.f32 1.442695, %v1955_v2  ;;  %v1684_v26 = vsel %vm1425_vm2, %v4716_v5, 0.0 }
 0x645   : > { %1685 = vadd.xlane.f32.xlu0 %v1684_v26 }
 0x646   : > { %3491 = vpow2.f32 %v1956_v25 }
 0x647   : > { %v4720_v12 = vpop.eup %3483 }
 0x648   : > { %v1708_v7 = vsel %vm1425_vm2, %v4720_v12, 0.0  ;;  %v4724_v27 = vpop.eup %3485 }
 0x649   : > { %1709 = vadd.xlane.f32.xlu1 %v1708_v7  ;;  %v1934_v29 = vsel %vm1425_vm2, %v4724_v27, 0.0 }
 0x64b   : > { %v4726_v28 = vpop.eup %3487 }
 0x64c   : > { %v1733_v15 = vsel %vm1425_vm2, %v4726_v28, 0.0  ;;  %v4732_v30 = vpop.eup %3489 }
 0x64d   : > { %1734 = vadd.xlane.f32.xlu0 %v1733_v15  ;;  %1935 = vadd.xlane.f32.xlu1 %v1934_v29  ;;  %v1983_v32 = vsel %vm1425_vm2, %v4732_v30, 0.0 }
 0x650   : > { %v4734_v31 = vpop.eup %3491 }
 0x651   : > { %v1958_v33 = vsel %vm1425_vm2, %v4734_v31, 0.0  ;;  %1984 = vadd.xlane.f32.xlu1 %v1983_v32 }
 0x652   : > { %1959 = vadd.xlane.f32.xlu0 %v1958_v33 }
 0x662   : > { %1996 = vrot.lane.b32.xlu1 %v4618_v21, %s3972_s16 }
 0x666   : > { %2078 = vrot.lane.b32.xlu1 %v4586_v10, %s3973_s24 }
 0x668   : > { %1747 = vrot.lane.b32.xlu0 %v4618_v21, %s3971_s11 }
 0x66a   : > { %2072 = vrot.lane.b32.xlu1 %v4590_v14, %s3973_s24 }
 0x66c   : > { %2074 = vrot.lane.b32.xlu0 %v4603_v17, %s3973_s24 }
 0x66e   : > { %2076 = vrot.lane.b32.xlu1 %v4605_v18, %s3973_s24 }
 0x6d2   : > { %v1686_v34 = vpop.xlane.xlu0 %1685 }
 0x6d3   : > { %v1687_v35 = vrot.slane %v1686_v34, 4 }
 0x6d5   : > { %v1688_v36 = vadd.f32 %v1687_v35, %v1686_v34 }
 0x6d6   : > { %v1710_v37 = vpop.xlane.xlu1 %1709 }
 0x6d7   : > { %v1689_v38 = vrot.slane %v1688_v36, 2  ;;  %v1711_v39 = vrot.slane %v1710_v37, 4 }
 0x6d9   : > { %v1690_v40 = vadd.f32 %v1689_v38, %v1688_v36  ;;  %v1712_v10 = vadd.f32 %v1711_v39, %v1710_v37 }
 0x6da   : > { %v1735_v41 = vpop.xlane.xlu0 %1734  ;;  %v1936_v42 = vpop.xlane.xlu1 %1935 }
 0x6db   : > { %v1691_v43 = vrot.slane %v1690_v40, 1  ;;  %v1713_v44 = vrot.slane %v1712_v10, 2  ;;  %v1736_v45 = vrot.slane %v1735_v41, 4  ;;  %v1937_v14 = vrot.slane %v1936_v42, 4 }
 0x6dd   : > { %v1692_v46 = vadd.f32 %v1691_v43, %v1690_v40  ;;  %v1714_v47 = vadd.f32 %v1713_v44, %v1712_v10  ;;  %v1737_v17 = vadd.f32 %v1736_v45, %v1735_v41  ;;  %v1938_v48 = vadd.f32 %v1937_v14, %v1936_v42 }
 0x6de   : > { %v1985_v49 = vpop.xlane.xlu1 %1984 }
 0x6df   : > { %3493 = vrcp.f32 %v1692_v46  ;;  %v1715_v18 = vrot.slane %v1714_v47, 1  ;;  %v1738_v50 = vrot.slane %v1737_v17, 2  ;;  %v1939_v51 = vrot.slane %v1938_v48, 2  ;;  %v1960_v52 = vpop.xlane.xlu0 %1959 }
 0x6e0   : > { %v1961_v53 = vrot.slane %v1960_v52, 4  ;;  %v1986_v54 = vrot.slane %v1985_v49, 4 }
 0x6e1   : > { %v1716_v55 = vadd.f32 %v1715_v18, %v1714_v47  ;;  %v1739_v56 = vadd.f32 %v1738_v50, %v1737_v17  ;;  %v1940_v57 = vadd.f32 %v1939_v51, %v1938_v48 }
 0x6e2   : > { %v1962_v58 = vadd.f32 %v1961_v53, %v1960_v52  ;;  %v1987_v60 = vadd.f32 %v1986_v54, %v1985_v49  ;;  %v1997_v38 = vpop.permute.xlu1 %1996 }
 0x6e3   : > { %3495 = vrcp.f32 %v1716_v55  ;;  %v1740_v61 = vrot.slane %v1739_v56, 1  ;;  %v1941_v63 = vrot.slane %v1940_v57, 1  ;;  %v1748_v3 = vpop.permute.xlu0 %1747 }
 0x6e4   : > { %v1963_v4 = vrot.slane %v1962_v58, 2  ;;  %v1988_v6 = vrot.slane %v1987_v60, 2  ;;  %3112 = vmatpush3.msra.mxu1 %v1748_v3 }
 0x6e5   : > { %v1741_v62 = vadd.f32 %v1740_v61, %v1739_v56  ;;  %v1942_v8 = vadd.f32 %v1941_v63, %v1940_v57  ;;  %3127 = vmatprep.subr.mxu1 %v3970_v1 }
 0x6e6   : > { %v1964_v9 = vadd.f32 %v1963_v4, %v1962_v58  ;;  %v1989_v11 = vadd.f32 %v1988_v6, %v1987_v60  ;;  %v2079_v41 = vpop.permute.xlu1 %2078 }
 0x6e7   : > { %3497 = vrcp.f32 %v1741_v62  ;;  %v2075_v43 = vpop.permute.xlu0 %2074 }
 0x6e8   : > { %3499 = vrcp.f32 %v1942_v8  ;;  %v1965_v13 = vrot.slane %v1964_v9, 1  ;;  %v1990_v16 = vrot.slane %v1989_v11, 1 }
 0x6e9   : > { %v3494_v19 = vpop.eup %3493 }
 0x6ea   : > { %v1694_v20 = vmul.f32 8.0, %v3494_v19  ;;  %v1966_v22 = vadd.f32 %v1965_v13, %v1964_v9  ;;  %v1991_v24 = vadd.f32 %v1990_v16, %v1989_v11 }
 0x6ec   : > { %v1695_v2 = vmul.f32 %v4716_v5, %v1694_v20  ;;  %3501 = vrcp.f32 %v1966_v22 }
 0x6ed   : > { %v3496_v25 = vpop.eup %3495  ;;  %3503 = vrcp.f32 %v1991_v24 }
 0x6ee   : > { %2433 = vst.msk [vmem:[%s4667_s19 + $0x8] sm:$0xff] %vm1425_vm2, %v1695_v2  ;;  %v1718_v26 = vmul.f32 8.0, %v3496_v25 }
 0x6f0   : > { %v1719_v7 = vmul.f32 %v4720_v12, %v1718_v26 }
 0x6f1   : > { %v3498_v15 = vpop.eup %3497 }
 0x6f2   : > { %v3500_v29 = vpop.eup %3499  ;;  %v1743_v32 = vmul.f32 8.0, %v3498_v15  ;;  %v1720_v34 = vadd.f32 %v1719_v7, %v1695_v2 }
 0x6f3   : > { %v1944_v33 = vmul.f32 8.0, %v3500_v29 }
 0x6f4   : > { %v1744_v35 = vmul.f32 %v4726_v28, %v1743_v32 }
 0x6f5   : > { %v1945_v36 = vmul.f32 %v4724_v27, %v1944_v33 }
 0x6f6   : > { %v3502_v37 = vpop.eup %3501  ;;  %v1745_v5 = vadd.f32 %v1744_v35, %v1720_v34 }
 0x6f7   : > { %v3504_v39 = vpop.eup %3503  ;;  %2434 = vst.msk [vmem:[%s4667_s19 + $0x10] sm:$0xff] %vm1425_vm2, %v1945_v36  ;;  %v1968_v40 = vmul.f32 8.0, %v3502_v37 }
 0x6f8   : > { %v1993_v10 = vmul.f32 8.0, %v3504_v39  ;;  %3114 = vmatmul.mubr.msk.f32.vlgmr.msra.gmra.mrb[12].mxu1 %vm1425_vm2, %v1745_v5 }
 0x6f9   : > { %v1969_v12 = vmul.f32 %v4734_v31, %v1968_v40  ;;  %3128 = vmatpush3.msra.mxu1 %v1997_v38  ;;  %3129 = vmatprep.mubr.msk.f32.mxu1 %vm3969_vm0, %v3970_v1  ;;  %v2073_v31 = vpop.permute.xlu1 %2072 }
 0x6fa   : > { %3132 = vmatprep.subr.mxu1 %v3970_v1  ;;  %v1994_v27 = vmul.f32 %v4732_v30, %v1993_v10 }
 0x6fb   : > { %v1970_v28 = vadd.f32 %v1969_v12, %v1945_v36 }
 0x6fd   : > { %v1995_v42 = vadd.f32 %v1994_v27, %v1970_v28  ;;  %v2077_v30 = vpop.permute.xlu1 %2076 }
 0x6ff   : > { %3130 = vmatmul.mubr.msk.f32.vlgmr.msra.gmra.mrb[14].mxu1 %vm1425_vm2, %v1995_v42 }
 0x700   : > { %3133 = vmatpush3.xpose.msk.msra.mxu1 %vm1329_vm1, %v2079_v41  ;;  %3134 = vmatprep.mubr.msk.f32.mxu1 %vm3969_vm0, %v3970_v1 }
 0x701   : > { %3303 = vmatprep.subr.bf16.mxu1 %v3968_v0 }
 0x703   : > { %3135 = vmatmul.mubr.msk.f32.vlgmr.msra.gmra.mrb[16].mxu1 %vm1329_vm1, %v2073_v31 }
 0x704   : > { %3137 = vmatprep.mubr.msk.f32.mxu1 %vm3969_vm0, %v3970_v1 }
 0x707   : > { %3138 = vmatmul.mubr.msk.f32.gmra.mrb[18].mxu1 %vm1329_vm1, %v2075_v43 }
 0x708   : > { %3140 = vmatprep.mubr.msk.f32.mxu1 %vm3969_vm0, %v3970_v1 }
 0x70b   : > { %3141 = vmatmul.mubr.msk.f32.gmra.mrb[20].mxu1 %vm1329_vm1, %v2077_v30 }
 0x70c   : > { %3180 = vmatprep.mubr.msk.f32.mxu1 %vm3969_vm0, %v3970_v1 }
 0x7cb   : > { %v1819_v44 = vpop.f32.mrb[12].mxu1 }
 0x7cc   : > { %v3115_v45 = vpop.f32.mrb[13].mxu1 }
 0x7d2   : > { %v2068_v14 = vpop.f32.mrb[14].mxu1 }
 0x7d3   : > { %v3131_v46 = vpop.f32.mrb[15].mxu1 }
 0x7d6   : > { %v2154_v47 = vpop.f32.mrb[16].mxu1 }
 0x7d7   : > { %v2168_v17 = vadd.f32 %v2154_v47, %v4625_v23  ;;  %v3136_v48 = vpop.f32.mrb[17].mxu1 }
 0x7d9   : > { %v2171_v49 = vsel %vm1425_vm2, %v2168_v17, -inf }
 0x7da   : > { %2172 = vmax.xlane.f32.xlu0 %v2171_v49  ;;  %v2159_v18 = vpop.f32.mrb[18].mxu1 }
 0x7db   : > { %v2169_v50 = vadd.f32 %v2159_v18, %v4625_v23  ;;  %v3139_v51 = vpop.f32.mrb[19].mxu1 }
 0x7dd   : > { %v2195_v52 = vsel %vm1425_vm2, %v2169_v50, -inf }
 0x7de   : > { %2196 = vmax.xlane.f32.xlu1 %v2195_v52  ;;  %v2164_v53 = vpop.f32.mrb[20].mxu1 }
 0x7df   : > { %v2170_v1 = vadd.f32 %v2164_v53, %v4625_v23  ;;  %v3142_v54 = vpop.f32.mrb[21].mxu1 }
 0x7e1   : > { %v2220_v55 = vsel %vm1425_vm2, %v2170_v1, -inf }
 0x7e2   : > { %2221 = vmax.xlane.f32.xlu0 %v2220_v55 }
 0x867   : > { %v2173_v56 = vpop.xlane.xlu0 %2172 }
 0x868   : > { %v2174_v57 = vrot.slane %v2173_v56, 4 }
 0x86a   : > { %v2175_v58 = vmax.f32 %v2173_v56, %v2174_v57 }
 0x86b   : > { %v2197_v60 = vpop.xlane.xlu1 %2196 }
 0x86c   : > { %v2176_v61 = vrot.slane %v2175_v58, 2  ;;  %v2198_v63 = vrot.slane %v2197_v60, 4 }
 0x86e   : > { %v2177_v3 = vmax.f32 %v2175_v58, %v2176_v61  ;;  %v2199_v4 = vmax.f32 %v2197_v60, %v2198_v63  ;;  %v2338_v61 = vld [vmem:[#allocation19] sm:$0xff]  ;;  %v2339_v63 = vld [vmem:[#allocation19 + $0x8] sm:$0xff] }
 0x86f   : > { %v2222_v6 = vpop.xlane.xlu0 %2221 }
 0x870   : > { %v2178_v62 = vrot.slane %v2177_v3, 1  ;;  %v2200_v8 = vrot.slane %v2199_v4, 2  ;;  %v2223_v9 = vrot.slane %v2222_v6, 4 }
 0x872   : > { %v2179_v11 = vmax.f32 %v2177_v3, %v2178_v62  ;;  %v2201_v13 = vmax.f32 %v2199_v4, %v2200_v8  ;;  %v2224_v16 = vmax.f32 %v2222_v6, %v2223_v9  ;;  %v2340_v3 = vld [vmem:[#allocation19 + $0x10] sm:$0xff]  ;;  %v3304_v4 = vpack.c.bf16 %v2339_v63, %v2338_v61  ;;  %v2341_v6 = vld [vmem:[#allocation19 + $0x18] sm:$0xff]  ;;  %v2342_v8 = vld [vmem:[#allocation19 + $0x20] sm:$0xff] }
 0x873   : > { %v3307_v62 = vpack.c.bf16 %v2341_v6, %v2340_v3  ;;  %v2343_v9 = vld [vmem:[#allocation19 + $0x28] sm:$0xff] }
 0x874   : > { %v2180_v23 = vsub.f32 %v2168_v17, %v2179_v11  ;;  %v2202_v19 = vrot.slane %v2201_v13, 1  ;;  %v2225_v20 = vrot.slane %v2224_v16, 2  ;;  %3305 = vmatpush3.bf16.msra.mxu1 %v3304_v4  ;;  %v3310_v11 = vpack.c.bf16 %v2343_v9, %v2342_v8 }
 0x875   : > { %3306 = vmatprep.subr.bf16.mxu1 %v3968_v0 }
 0x876   : > { %v2181_v22 = vmul.f32 1.442695, %v2180_v23  ;;  %v2203_v24 = vmax.f32 %v2201_v13, %v2202_v19  ;;  %v2226_v2 = vmax.f32 %v2224_v16, %v2225_v20  ;;  %v2344_v13 = vld [vmem:[#allocation19 + $0x30] sm:$0xff]  ;;  %v2345_v16 = vld [vmem:[#allocation19 + $0x38] sm:$0xff]  ;;  %v2346_v19 = vld [vmem:[#allocation19 + $0x40] sm:$0xff] }
 0x877   : > { %v3313_v23 = vpack.c.bf16 %v2345_v16, %v2344_v13  ;;  %v2347_v20 = vld [vmem:[#allocation19 + $0x48] sm:$0xff] }
 0x878   : > { %3505 = vpow2.f32 %v2181_v22  ;;  %v2204_v25 = vsub.f32 %v2169_v50, %v2203_v24  ;;  %v2227_v26 = vrot.slane %v2226_v2, 1  ;;  %3308 = vmatpush3.bf16.msra.mxu1 %v3307_v62  ;;  %v3316_v22 = vpack.c.bf16 %v2347_v20, %v2346_v19  ;;  %v2348_v24 = vld [vmem:[#allocation19 + $0x50] sm:$0xff] }
 0x879   : > { %3309 = vmatprep.subr.bf16.mxu1 %v3968_v0 }
 0x87a   : > { %v2205_v7 = vmul.f32 1.442695, %v2204_v25  ;;  %v2228_v15 = vmax.f32 %v2226_v2, %v2227_v26  ;;  %v2349_v2 = vld [vmem:[#allocation19 + $0x58] sm:$0xff]  ;;  %v2350_v26 = vld [vmem:[#allocation19 + $0x60] sm:$0xff] }
 0x87b   : > { %v3319_v25 = vpack.c.bf16 %v2349_v2, %v2348_v24 }
 0x87c   : > { %3507 = vpow2.f32 %v2205_v7  ;;  %v2229_v29 = vsub.f32 %v2170_v1, %v2228_v15  ;;  %3311 = vmatpush3.bf16.msra.mxu1 %v3310_v11  ;;  %v2351_v7 = vld [vmem:[#allocation19 + $0x68] sm:$0xff] }
 0x87d   : > { %3312 = vmatprep.subr.bf16.mxu1 %v3968_v0  ;;  %v3322_v15 = vpack.c.bf16 %v2351_v7, %v2350_v26 }
 0x87e   : > { %v2230_v32 = vmul.f32 1.442695, %v2229_v29  ;;  %v2352_v29 = vld [vmem:[#allocation19 + $0x70] sm:$0xff] }
 0x880   : > { %3509 = vpow2.f32 %v2230_v32  ;;  %3314 = vmatpush3.bf16.msra.mxu1 %v3313_v23  ;;  %v2353_v32 = vld [vmem:[#allocation19 + $0x78] sm:$0xff] }
 0x881   : > { %3315 = vmatprep.subr.bf16.mxu1 %v3968_v0 }
 0x882   : > { %v3506_v33 = vpop.eup %3505 }
 0x883   : > { %v2183_v34 = vsel %vm1425_vm2, %v3506_v33, 0.0 }
 0x884   : > { %2184 = vadd.xlane.f32.xlu0 %v2183_v34  ;;  %3317 = vmatpush3.bf16.msra.mxu1 %v3316_v22 }
 0x885   : > { %3318 = vmatprep.subr.bf16.mxu1 %v3968_v0 }
 0x886   : > { %v3508_v35 = vpop.eup %3507 }
 0x887   : > { %v2207_v36 = vsel %vm1425_vm2, %v3508_v35, 0.0 }
 0x888   : > { %2208 = vadd.xlane.f32.xlu0 %v2207_v36  ;;  %3320 = vmatpush3.bf16.msra.mxu1 %v3319_v25 }
 0x889   : > { %3321 = vmatprep.subr.bf16.mxu1 %v3968_v0 }
 0x88a   : > { %v3510_v37 = vpop.eup %3509 }
 0x88b   : > { %v2232_v5 = vsel %vm1425_vm2, %v3510_v37, 0.0 }
 0x88c   : > { %2233 = vadd.xlane.f32.xlu1 %v2232_v5  ;;  %3323 = vmatpush3.bf16.msra.mxu1 %v3322_v15 }
 0x88d   : > { %3324 = vmatprep.subr.bf16.mxu1 %v3968_v0 }
 0x89d   : > { %2322 = vrot.lane.b32.xlu1 %v1819_v44, %s3973_s24 }
 0x89e   : > { %2245 = vrot.lane.b32.xlu0 %v4618_v21, %s3973_s24 }
 0x8a1   : > { %2326 = vrot.lane.b32.xlu1 %v2068_v14, %s3972_s16 }
 0x911   : > { %v2185_v38 = vpop.xlane.xlu0 %2184 }
 0x912   : > { %v2186_v39 = vrot.slane %v2185_v38, 4 }
 0x914   : > { %v2187_v40 = vadd.f32 %v2186_v39, %v2185_v38 }
 0x915   : > { %v2209_v10 = vpop.xlane.xlu0 %2208 }
 0x916   : > { %v2188_v12 = vrot.slane %v2187_v40, 2  ;;  %v2210_v28 = vrot.slane %v2209_v10, 4 }
 0x918   : > { %v2189_v27 = vadd.f32 %v2188_v12, %v2187_v40  ;;  %v2211_v41 = vadd.f32 %v2210_v28, %v2209_v10 }
 0x919   : > { %v2246_v42 = vpop.permute.xlu0 %2245  ;;  %v2234_v31 = vpop.xlane.xlu1 %2233 }
 0x91a   : > { %v2190_v43 = vrot.slane %v2189_v27, 1  ;;  %v2212_v30 = vrot.slane %v2211_v41, 2  ;;  %v2235_v45 = vrot.slane %v2234_v31, 4  ;;  %3144 = vmatpush3.msra.mxu0 %v2246_v42 }
 0x91c   : > { %v2191_v44 = vadd.f32 %v2190_v43, %v2189_v27  ;;  %v2213_v46 = vadd.f32 %v2212_v30, %v2211_v41  ;;  %v2236_v21 = vadd.f32 %v2235_v45, %v2234_v31 }
 0x91d   : > { %v2323_v36 = vpop.permute.xlu1 %2322 }
 0x91e   : > { %3511 = vrcp.f32 %v2191_v44  ;;  %v2214_v14 = vrot.slane %v2213_v46, 1  ;;  %v2237_v47 = vrot.slane %v2236_v21, 2  ;;  %v2333_v5 = vsel %vm1329_vm1, %v4690_v59, %v2323_v36 }
 0x920   : > { %v2215_v17 = vadd.f32 %v2214_v14, %v2213_v46  ;;  %v2238_v48 = vadd.f32 %v2237_v47, %v2236_v21 }
 0x922   : > { %3513 = vrcp.f32 %v2215_v17  ;;  %v2239_v49 = vrot.slane %v2238_v48, 1 }
 0x924   : > { %v2240_v18 = vadd.f32 %v2239_v49, %v2238_v48 }
 0x926   : > { %3515 = vrcp.f32 %v2240_v18 }
 0x928   : > { %v3512_v50 = vpop.eup %3511 }
 0x929   : > { %v2193_v51 = vmul.f32 8.0, %v3512_v50 }
 0x92b   : > { %v2194_v52 = vmul.f32 %v3506_v33, %v2193_v51  ;;  %v3325_v33 = vpack.c.bf16 %v2353_v32, %v2352_v29 }
 0x92c   : > { %v3514_v53 = vpop.eup %3513 }
 0x92d   : > { %2435 = vst.msk [vmem:[%s4667_s19 + $0x18] sm:$0xff] %vm1425_vm2, %v2194_v52  ;;  %v2217_v1 = vmul.f32 8.0, %v3514_v53  ;;  %3326 = vmatpush3.bf16.msra.mxu1 %v3325_v33 }
 0x92f   : > { %v2218_v54 = vmul.f32 %v3508_v35, %v2217_v1 }
 0x930   : > { %v3516_v55 = vpop.eup %3515 }
 0x931   : > { %v2242_v56 = vmul.f32 8.0, %v3516_v55  ;;  %v2219_v57 = vadd.f32 %v2218_v54, %v2194_v52 }
 0x933   : > { %v2243_v58 = vmul.f32 %v3510_v37, %v2242_v56  ;;  %v2327_v37 = vpop.permute.xlu1 %2326 }
 0x934   : > { %v2335_v38 = vsel %vm2334_vm3, %v2333_v5, %v2327_v37 }
 0x935   : > { %v2244_v60 = vadd.f32 %v2243_v58, %v2219_v57 }
 0x937   : > { %3146 = vmatmul.mubr.msk.f32.vlgmr.msra.gmra.mrb[18].mxu0 %vm1425_vm2, %v2244_v60 }
 0xa0a   : > { %v2317_v34 = vpop.f32.mrb[18].mxu0 }
 0xa0b   : > { %2330 = vrot.lane.b32.xlu1 %v2317_v34, %s3971_s11  ;;  %v3147_v35 = vpop.f32.mrb[19].mxu0 }
 0xa7d   : > { %v2331_v39 = vpop.permute.xlu1 %2330 }
 0xa7e   : > { %v2337_v40 = vsel %vm2336_vm4, %v2335_v38, %v2331_v39 }
 0xa7f   : > { %3181 = vmatmul.mubr.f32.vlgmr.msra.gmra.mrb[22].mxu1 %v2337_v40 }
 0xa80   : > { %3848 = shalt.err (!%p3845_p6)
}
 0xa81   : > { %s3849_s18 = scalar_lea.hbm %s4812_s15, 512  ;;  %s3853_s11 = scalar_lea.hbm %s5012_s25, 1024 }
 0xa82   : > { %p3850_p11 = scmp.ne.s32.totalorder %s4812_s15, %s3849_s18  ;;  %p3854_p0 = scmp.lt.u32.totalorder %s4812_s15, %s5012_s25 }
 0xa83   : > { %p3855_p7 = scmp.lt.u32.totalorder %s3853_s11, %s3849_s18  ;;  %p3857_p13 = scmp.lt.u32.totalorder %s3849_s18, %s4812_s15 }
 0xa84   : > { %p3851_p4 = pnand %p3850_p11, %p5013_p9 }
 0xa85   : > { %p3856_p12 = por %p3855_p7, %p3854_p0 }
 0xa86   : > { %p3852_p10 = pneg %p3851_p4 }
 0xa87   : > { %p3858_p5 = por %p3857_p13, %p3856_p12 }
 0xa89   : > { %p3859_p1 = pnand %p3858_p5, %p3852_p10 }
 0xa8b   : > { %3862 = shalt.err (!%p3859_p1)
}
 0xa8c   : > { %s3975_s19 = smov 128   ;;  %s3976_s24 = smov 8  }
 0xa8d   : > { %3362 = dma.vmem_to_hbm [thread:$0]  (%p5013_p9), %s4814_s5, 512, %s4812_s15, %s2442_s28, %s3975_s19, %s3975_s19, %s3976_s24  }
 0xa8e   : > { %s5014_s7 = sld [smem:[#allocation50_spill]]  ;;  %s2777_s22 = sshll.u32 %s4998_s1, 7 }
 0xa8f   : > { %s850_s26 = scalar_lea.vmem [#allocation20], %s4481_s0  ;;  %s5015_s14 = sld [smem:[#allocation52_spill]] }
 0xa90   : > { %s2455_s23 = sshll.u32 %s850_s26, 4  ;;  %s2437_s5 = scalar_lea.sflag [#allocation4], %s4478_s29  ;;  %s4850_s23 = int_to_ptr.vmem [resolvable:$true] %s2455_s23 }
 0xa91   : > { %s3863_s15 = scalar_lea.vmem %s4850_s23, 128  ;;  %s3977_s0 = smov [#allocation20]  }
 0xa92   : > { %p3864_p3 = scmp.ne.s32.totalorder %s4850_s23, %s3863_s15  ;;  %s3867_s1 = sshll.u32 %s3977_s0, 4  ;;  %s3868_s1 = int_to_ptr.vmem [resolvable:$false] %s3867_s1 }
 0xa93   : > { %s3869_s28 = scalar_lea.vmem %s3868_s1, 256  ;;  %p3870_p6 = scmp.lt.s32.totalorder %s4850_s23, %s3868_s1 }
 0xa94   : > { %v2774_v0 = vld [vmem:[%s5014_s7] ss:$0 sm:$0xff]  ;;  %p3865_p8 = pnand %p3864_p3, %p5013_p9  ;;  %p3871_p11 = scmp.lt.s32.totalorder %s3869_s28, %s3863_s15 }
 0xa95   : > { %s4848_s13 = scalar_lea.hbm %s5015_s14, %s2777_s22 }
 0xa96   : > { %p3866_p2 = pneg %p3865_p8  ;;  %p3872_p4 = por %p3871_p11, %p3870_p6 }
 0xa98   : > { %p3873_p10 = pnand %p3872_p4, %p3866_p2 }
 0xb52   : > { %v2427_v59 = vpop.f32.mrb[22].mxu1 }
 0xb53   : > { %v2428_v10 = vadd.f32 %v2774_v0, %v2427_v59  ;;  %v3182_v12 = vpop.f32.mrb[23].mxu1 }
 0xb55   : > { %2431 = vst [vmem:[%s850_s26] sm:$0xff] %v2428_v10 }
 0xb56   : > { %3876 = shalt.err (!%p3873_p10)
}
 0xb57   : > { %s3877_s29 = scalar_lea.hbm %s4848_s13, 128  ;;  %s3881_s27 = scalar_lea.hbm %s5015_s14, 256 }
 0xb58   : > { %p3878_p0 = scmp.ne.s32.totalorder %s4848_s13, %s3877_s29  ;;  %p3882_p13 = scmp.lt.u32.totalorder %s4848_s13, %s5015_s14 }
 0xb59   : > { %p3883_p5 = scmp.lt.u32.totalorder %s3881_s27, %s3877_s29  ;;  %p3885_p3 = scmp.lt.u32.totalorder %s3877_s29, %s4848_s13 }
 0xb5a   : > { %p3879_p7 = pnand %p3878_p0, %p5013_p9 }
 0xb5b   : > { %p3884_p1 = por %p3883_p5, %p3882_p13 }
 0xb5c   : > { %p3880_p12 = pneg %p3879_p7 }
 0xb5d   : > { %p3886_p8 = por %p3885_p3, %p3884_p1 }
 0xb5f   : > { %p3887_p2 = pnand %p3886_p8, %p3880_p12 }
 0xb61   : > { %3890 = shalt.err (!%p3887_p2)
}
 0xb62   : > { %3361 = dma.vmem_to_hbm [thread:$0]  (%p5013_p9), %s4850_s23, 128, %s4848_s13, %s2437_s5  }
 0xb63 PF: > { %s5016_s3 = sld [smem:[#allocation31_spill]]  ;;  %s5017_s9 = sld [smem:[#allocation37_spill]] }
 0xb64   : > { %s5018_s7 = sld [smem:[#allocation32_spill]] }
 0xb69   : > { %s2483_s22 = sand.u32 1, %s5016_s3   ;;  %p5019_p6 = scmp.ne.s32.totalorder %s5017_s9, 0 }
 0xb6a   : > { %p5020_p11 = scmp.ge.s32.totalorder %s5018_s7, 2  ;;  %s2484_s26 = scalar_lea.sflag [#allocation4], %s2483_s22 }
 0xb6c   : > { %p3401_p4 = pnand %p5020_p11, %p5019_p6 }
 0xb6e   : > { %3932 = dma.done.wait (!%p3401_p4), %s2484_s26, 128  }
 0xb6f   : > { %3934 = vsyncadd (!%p3401_p4), %s2484_s26, 4294967168  ;;  %s2493_s12 = scalar_lea.sflag [#allocation22], %s2483_s22 }
 0xb70   : > { %3936 = dma.done.wait (!%p3401_p4), %s2493_s12, 512  }
 0xb71   : > { %3938 = vsyncadd (!%p3401_p4), %s2493_s12, 4294966784  ;;  %s5021_s21 = sld [smem:[#allocation34_spill]]  ;;  %s5022_s18 = sld [smem:[#allocation35_spill]] }
 0xb72   : > { %s5023_s0 = smov %s3945_s30  ;;  %s5024_s30 = smov %s3949_s20 }
 0xb77   : > { %p45_p9 = scmp.ge.s32.totalorder %s5021_s21, 4   ;;  %s5025_s20 = smov %s5022_s18 }
 0xb79   :  { %47 = sbr.rel (!%p45_p9) target bundleno = 31 (0x1f), region = 226 }
 0xb80   :  { %2498 = vsyncpa [#allocation3], 1 }
 0xb81   :  { %2500 = vsyncpa [#allocation3 + $0x1], 1 }
 0xb82   :  { %2501 = vsyncpa [#allocation6], 1 }
 0xb83   :  { %2503 = vsyncpa [#allocation6 + $0x1], 1 }
 0xb84   :  { %2504 = vsyncpa [#allocation9], 1 }
 0xb85   :  { %2506 = vsyncpa [#allocation9 + $0x1], 1 }
 0xb86   :  { %2507 = vsyncpa [#allocation12], 1 }
 0xb87   :  { %2508 = vsyncpa [#allocation15], 1 }
 0xb88   :  { %2509 = vsyncpa [#allocation18], 1 }
 0xb89   :  { %2510 = vsyncpa [#allocation4], 1 }
 0xb8a   :  { %2512 = vsyncpa [#allocation4 + $0x1], 1 }
 0xb8b   :  { %2513 = vsyncpa [#allocation22], 1 }
 0xb8c   :  { %2515 = vsyncpa [#allocation22 + $0x1], 1 }

</bundles_post_ra>
